<compile_context>
chip_gen: v7x
topology: tpu7x:2x2x1
jax: 0.10.0
libtpu: 0.0.40
codegen_flags: <defaults>
</compile_context>

<pallas_src>
import math
import jax
import jax.numpy as jnp
from jax.experimental import pallas as pl
from jax.experimental.pallas import tpu as pltpu

IN_DIM = 5
HID_DIM = 10
OUT_DIM = 1
TM = 512  # batch tile (lanes); moderate so v5e's 16 MiB scoped VMEM is never an issue


def critic_kernel(x_ref, w1_ref, b1_ref, w2_ref, b2_ref, out_ref):
    # x_ref: (IN_DIM, TM) in VMEM  -- batch on lanes, features on sublanes.
    # w1_ref: (IN_DIM, HID_DIM), b1_ref: (1, HID_DIM),
    # w2_ref: (1, HID_DIM), b2_ref: (1, 1)   -- all scalars in SMEM.
    x = x_ref[...]  # (IN_DIM, TM) f32
    acc = None
    # Fully unrolled VPU broadcast-multiply-accumulate: 10 hidden units x 5 FMAs,
    # ReLU, then a 10-term weighted sum for the value head. MXU never touched.
    for j in range(HID_DIM):
        h = x[0:1, :] * w1_ref[0, j]
        for k in range(1, IN_DIM):
            h = h + x[k:k + 1, :] * w1_ref[k, j]
        h = jnp.maximum(h + b1_ref[0, j], 0.0)
        term = h * w2_ref[0, j]
        acc = term if acc is None else acc + term
    v = acc + b2_ref[0, 0]
    out_ref[...] = v.astype(out_ref.dtype)  # (1, TM) lane-dense store


def critic_forward(x, w1, b1, w2, b2, *, tm=TM):
    """x: (B, IN_DIM) f32.  Returns (B, OUT_DIM) f32, matching CriticNet.forward."""
    B = x.shape[0]
    xt = x.T  # (IN_DIM, B): batch on the fast (lane) axis
    b_pad = pl.cdiv(B, tm) * tm
    if b_pad != B:
        xt = jnp.pad(xt, ((0, 0), (0, b_pad - B)))
    grid = (b_pad // tm,)

    n_param = IN_DIM * HID_DIM + HID_DIM + HID_DIM + 1  # 66 scalars
    cost = pl.CostEstimate(
        flops=2 * b_pad * (IN_DIM * HID_DIM + HID_DIM),
        transcendentals=0,
        bytes_accessed=b_pad * (IN_DIM + OUT_DIM) * 4 + n_param * 4,
    )

    out_t = pl.pallas_call(
        critic_kernel,
        out_shape=jax.ShapeDtypeStruct((OUT_DIM, b_pad), jnp.float32),
        grid=grid,
        in_specs=[
            # Input stream: tiled over batch (lanes), double-buffered by Pallas.
            pl.BlockSpec((IN_DIM, tm), lambda i: (0, i)),
            # Parameters: resident SMEM scalars, same block every grid step.
            pl.BlockSpec((IN_DIM, HID_DIM), lambda i: (0, 0), memory_space=pltpu.SMEM),
            pl.BlockSpec((1, HID_DIM), lambda i: (0, 0), memory_space=pltpu.SMEM),
            pl.BlockSpec((1, HID_DIM), lambda i: (0, 0), memory_space=pltpu.SMEM),
            pl.BlockSpec((1, 1), lambda i: (0, 0), memory_space=pltpu.SMEM),
        ],
        out_specs=pl.BlockSpec((OUT_DIM, tm), lambda i: (0, i)),
        compiler_params=pltpu.CompilerParams(
            dimension_semantics=("parallel",),
        ),
        cost_estimate=cost,
    )(xt, w1, b1, w2, b2)

    return out_t[:, :B].T  # back to (B, OUT_DIM)


def init_params(key):
    """Deterministic init matching PyTorch nn.Linear defaults
    (uniform(-1/sqrt(fan_in), 1/sqrt(fan_in)) for weight and bias).
    Layouts are kernel-friendly: w1 stored (in, out); w2 stored (out, in)=(1,10)
    which is exactly PyTorch's v_head.weight layout."""
    k1, k2, k3, k4 = jax.random.split(key, 4)
    bound1 = 1.0 / math.sqrt(IN_DIM)
    bound2 = 1.0 / math.sqrt(HID_DIM)
    w1 = jax.random.uniform(k1, (IN_DIM, HID_DIM), jnp.float32, -bound1, bound1)
    b1 = jax.random.uniform(k2, (1, HID_DIM), jnp.float32, -bound1, bound1)
    w2 = jax.random.uniform(k3, (1, HID_DIM), jnp.float32, -bound2, bound2)
    b2 = jax.random.uniform(k4, (1, OUT_DIM), jnp.float32, -bound2, bound2)
    return w1, b1, w2, b2


def reference_forward(x, w1, b1, w2, b2):
    h = jnp.maximum(x @ w1 + b1, 0.0)       # (B, HID)
    return h @ w2.T + b2                     # (B, 1)


if __name__ == "__main__":
    key = jax.random.PRNGKey(0)
    kx, kp = jax.random.split(key)
    batch = 8
    x = jax.random.normal(kx, (batch, IN_DIM), jnp.float32)
    w1, b1, w2, b2 = init_params(kp)

    out = critic_forward(x, w1, b1, w2, b2)
    out = jax.block_until_ready(out)

    ref = reference_forward(x, w1, b1, w2, b2)
    assert out.shape == (batch, OUT_DIM)
    assert jnp.allclose(out, ref, atol=1e-5, rtol=1e-5)
    print("KERNEL_OK")
</pallas_src>

<mosaic_0001>
module attributes {stable_mosaic.version = 11 : i64} {
  func.func @critic_kernel(%arg0: i32, %arg1: memref<5x512xf32, #tpu.memory_space<vmem>>, %arg2: memref<5x10xf32, #tpu.memory_space<smem>>, %arg3: memref<1x10xf32, #tpu.memory_space<smem>>, %arg4: memref<1x10xf32, #tpu.memory_space<smem>>, %arg5: memref<1x1xf32, #tpu.memory_space<smem>>, %arg6: memref<1x512xf32, #tpu.memory_space<vmem>>) attributes {dimension_semantics = [#tpu.dimension_semantics<parallel>], iteration_bounds = array<i64: 1>, scalar_prefetch = 0 : i64, scratch_operands = 0 : i64, tpu.core_type = #tpu.core_type<tc>, window_params = [{transform_indices = @transform_0, window_bounds = array<i64: 5, 512>}, {transform_indices = @transform_1, window_bounds = array<i64: 5, 10>}, {transform_indices = @transform_2, window_bounds = array<i64: 1, 10>}, {transform_indices = @transform_3, window_bounds = array<i64: 1, 10>}, {transform_indices = @transform_4, window_bounds = array<i64: 1, 1>}, {transform_indices = @transform_5, window_bounds = array<i64: 1, 512>}]} {
    %c0 = arith.constant 0 : index
    %c0_0 = arith.constant 0 : index
    %0 = vector.load %arg1[%c0, %c0_0] : memref<5x512xf32, #tpu.memory_space<vmem>>, vector<5x512xf32>
    %1 = vector.extract_strided_slice %0 {offsets = [0, 0], sizes = [1, 512], strides = [1, 1]} : vector<5x512xf32> to vector<1x512xf32>
    %c0_1 = arith.constant 0 : index
    %c0_2 = arith.constant 0 : index
    %2 = memref.load %arg2[%c0_1, %c0_2] : memref<5x10xf32, #tpu.memory_space<smem>>
    %3 = vector.broadcast %2 : f32 to vector<1x512xf32>
    %4 = arith.mulf %1, %3 : vector<1x512xf32>
    %5 = vector.extract_strided_slice %0 {offsets = [1, 0], sizes = [1, 512], strides = [1, 1]} : vector<5x512xf32> to vector<1x512xf32>
    %c1 = arith.constant 1 : index
    %c0_3 = arith.constant 0 : index
    %6 = memref.load %arg2[%c1, %c0_3] : memref<5x10xf32, #tpu.memory_space<smem>>
    %7 = vector.broadcast %6 : f32 to vector<1x512xf32>
    %8 = arith.mulf %5, %7 : vector<1x512xf32>
    %9 = arith.addf %4, %8 : vector<1x512xf32>
    %10 = vector.extract_strided_slice %0 {offsets = [2, 0], sizes = [1, 512], strides = [1, 1]} : vector<5x512xf32> to vector<1x512xf32>
    %c2 = arith.constant 2 : index
    %c0_4 = arith.constant 0 : index
    %11 = memref.load %arg2[%c2, %c0_4] : memref<5x10xf32, #tpu.memory_space<smem>>
    %12 = vector.broadcast %11 : f32 to vector<1x512xf32>
    %13 = arith.mulf %10, %12 : vector<1x512xf32>
    %14 = arith.addf %9, %13 : vector<1x512xf32>
    %15 = vector.extract_strided_slice %0 {offsets = [3, 0], sizes = [1, 512], strides = [1, 1]} : vector<5x512xf32> to vector<1x512xf32>
    %c3 = arith.constant 3 : index
    %c0_5 = arith.constant 0 : index
    %16 = memref.load %arg2[%c3, %c0_5] : memref<5x10xf32, #tpu.memory_space<smem>>
    %17 = vector.broadcast %16 : f32 to vector<1x512xf32>
    %18 = arith.mulf %15, %17 : vector<1x512xf32>
    %19 = arith.addf %14, %18 : vector<1x512xf32>
    %20 = vector.extract_strided_slice %0 {offsets = [4, 0], sizes = [1, 512], strides = [1, 1]} : vector<5x512xf32> to vector<1x512xf32>
    %c4 = arith.constant 4 : index
    %c0_6 = arith.constant 0 : index
    %21 = memref.load %arg2[%c4, %c0_6] : memref<5x10xf32, #tpu.memory_space<smem>>
    %22 = vector.broadcast %21 : f32 to vector<1x512xf32>
    %23 = arith.mulf %20, %22 : vector<1x512xf32>
    %24 = arith.addf %19, %23 : vector<1x512xf32>
    %c0_7 = arith.constant 0 : index
    %c0_8 = arith.constant 0 : index
    %25 = memref.load %arg3[%c0_7, %c0_8] : memref<1x10xf32, #tpu.memory_space<smem>>
    %26 = vector.broadcast %25 : f32 to vector<1x512xf32>
    %27 = arith.addf %24, %26 : vector<1x512xf32>
    %cst = arith.constant 0.000000e+00 : f32
    %28 = vector.broadcast %cst : f32 to vector<1x512xf32>
    %29 = arith.maximumf %27, %28 : vector<1x512xf32>
    %c0_9 = arith.constant 0 : index
    %c0_10 = arith.constant 0 : index
    %30 = memref.load %arg4[%c0_9, %c0_10] : memref<1x10xf32, #tpu.memory_space<smem>>
    %31 = vector.broadcast %30 : f32 to vector<1x512xf32>
    %32 = arith.mulf %29, %31 : vector<1x512xf32>
    %33 = vector.extract_strided_slice %0 {offsets = [0, 0], sizes = [1, 512], strides = [1, 1]} : vector<5x512xf32> to vector<1x512xf32>
    %c0_11 = arith.constant 0 : index
    %c1_12 = arith.constant 1 : index
    %34 = memref.load %arg2[%c0_11, %c1_12] : memref<5x10xf32, #tpu.memory_space<smem>>
    %35 = vector.broadcast %34 : f32 to vector<1x512xf32>
    %36 = arith.mulf %33, %35 : vector<1x512xf32>
    %37 = vector.extract_strided_slice %0 {offsets = [1, 0], sizes = [1, 512], strides = [1, 1]} : vector<5x512xf32> to vector<1x512xf32>
    %c1_13 = arith.constant 1 : index
    %c1_14 = arith.constant 1 : index
    %38 = memref.load %arg2[%c1_13, %c1_14] : memref<5x10xf32, #tpu.memory_space<smem>>
    %39 = vector.broadcast %38 : f32 to vector<1x512xf32>
    %40 = arith.mulf %37, %39 : vector<1x512xf32>
    %41 = arith.addf %36, %40 : vector<1x512xf32>
    %42 = vector.extract_strided_slice %0 {offsets = [2, 0], sizes = [1, 512], strides = [1, 1]} : vector<5x512xf32> to vector<1x512xf32>
    %c2_15 = arith.constant 2 : index
    %c1_16 = arith.constant 1 : index
    %43 = memref.load %arg2[%c2_15, %c1_16] : memref<5x10xf32, #tpu.memory_space<smem>>
    %44 = vector.broadcast %43 : f32 to vector<1x512xf32>
    %45 = arith.mulf %42, %44 : vector<1x512xf32>
    %46 = arith.addf %41, %45 : vector<1x512xf32>
    %47 = vector.extract_strided_slice %0 {offsets = [3, 0], sizes = [1, 512], strides = [1, 1]} : vector<5x512xf32> to vector<1x512xf32>
    %c3_17 = arith.constant 3 : index
    %c1_18 = arith.constant 1 : index
    %48 = memref.load %arg2[%c3_17, %c1_18] : memref<5x10xf32, #tpu.memory_space<smem>>
    %49 = vector.broadcast %48 : f32 to vector<1x512xf32>
    %50 = arith.mulf %47, %49 : vector<1x512xf32>
    %51 = arith.addf %46, %50 : vector<1x512xf32>
    %52 = vector.extract_strided_slice %0 {offsets = [4, 0], sizes = [1, 512], strides = [1, 1]} : vector<5x512xf32> to vector<1x512xf32>
    %c4_19 = arith.constant 4 : index
    %c1_20 = arith.constant 1 : index
    %53 = memref.load %arg2[%c4_19, %c1_20] : memref<5x10xf32, #tpu.memory_space<smem>>
    %54 = vector.broadcast %53 : f32 to vector<1x512xf32>
    %55 = arith.mulf %52, %54 : vector<1x512xf32>
    %56 = arith.addf %51, %55 : vector<1x512xf32>
    %c0_21 = arith.constant 0 : index
    %c1_22 = arith.constant 1 : index
    %57 = memref.load %arg3[%c0_21, %c1_22] : memref<1x10xf32, #tpu.memory_space<smem>>
    %58 = vector.broadcast %57 : f32 to vector<1x512xf32>
    %59 = arith.addf %56, %58 : vector<1x512xf32>
    %cst_23 = arith.constant 0.000000e+00 : f32
    %60 = vector.broadcast %cst_23 : f32 to vector<1x512xf32>
    %61 = arith.maximumf %59, %60 : vector<1x512xf32>
    %c0_24 = arith.constant 0 : index
    %c1_25 = arith.constant 1 : index
    %62 = memref.load %arg4[%c0_24, %c1_25] : memref<1x10xf32, #tpu.memory_space<smem>>
    %63 = vector.broadcast %62 : f32 to vector<1x512xf32>
    %64 = arith.mulf %61, %63 : vector<1x512xf32>
    %65 = arith.addf %32, %64 : vector<1x512xf32>
    %66 = vector.extract_strided_slice %0 {offsets = [0, 0], sizes = [1, 512], strides = [1, 1]} : vector<5x512xf32> to vector<1x512xf32>
    %c0_26 = arith.constant 0 : index
    %c2_27 = arith.constant 2 : index
    %67 = memref.load %arg2[%c0_26, %c2_27] : memref<5x10xf32, #tpu.memory_space<smem>>
    %68 = vector.broadcast %67 : f32 to vector<1x512xf32>
    %69 = arith.mulf %66, %68 : vector<1x512xf32>
    %70 = vector.extract_strided_slice %0 {offsets = [1, 0], sizes = [1, 512], strides = [1, 1]} : vector<5x512xf32> to vector<1x512xf32>
    %c1_28 = arith.constant 1 : index
    %c2_29 = arith.constant 2 : index
    %71 = memref.load %arg2[%c1_28, %c2_29] : memref<5x10xf32, #tpu.memory_space<smem>>
    %72 = vector.broadcast %71 : f32 to vector<1x512xf32>
    %73 = arith.mulf %70, %72 : vector<1x512xf32>
    %74 = arith.addf %69, %73 : vector<1x512xf32>
    %75 = vector.extract_strided_slice %0 {offsets = [2, 0], sizes = [1, 512], strides = [1, 1]} : vector<5x512xf32> to vector<1x512xf32>
    %c2_30 = arith.constant 2 : index
    %c2_31 = arith.constant 2 : index
    %76 = memref.load %arg2[%c2_30, %c2_31] : memref<5x10xf32, #tpu.memory_space<smem>>
    %77 = vector.broadcast %76 : f32 to vector<1x512xf32>
    %78 = arith.mulf %75, %77 : vector<1x512xf32>
    %79 = arith.addf %74, %78 : vector<1x512xf32>
    %80 = vector.extract_strided_slice %0 {offsets = [3, 0], sizes = [1, 512], strides = [1, 1]} : vector<5x512xf32> to vector<1x512xf32>
    %c3_32 = arith.constant 3 : index
    %c2_33 = arith.constant 2 : index
    %81 = memref.load %arg2[%c3_32, %c2_33] : memref<5x10xf32, #tpu.memory_space<smem>>
    %82 = vector.broadcast %81 : f32 to vector<1x512xf32>
    %83 = arith.mulf %80, %82 : vector<1x512xf32>
    %84 = arith.addf %79, %83 : vector<1x512xf32>
    %85 = vector.extract_strided_slice %0 {offsets = [4, 0], sizes = [1, 512], strides = [1, 1]} : vector<5x512xf32> to vector<1x512xf32>
    %c4_34 = arith.constant 4 : index
    %c2_35 = arith.constant 2 : index
    %86 = memref.load %arg2[%c4_34, %c2_35] : memref<5x10xf32, #tpu.memory_space<smem>>
    %87 = vector.broadcast %86 : f32 to vector<1x512xf32>
    %88 = arith.mulf %85, %87 : vector<1x512xf32>
    %89 = arith.addf %84, %88 : vector<1x512xf32>
    %c0_36 = arith.constant 0 : index
    %c2_37 = arith.constant 2 : index
    %90 = memref.load %arg3[%c0_36, %c2_37] : memref<1x10xf32, #tpu.memory_space<smem>>
    %91 = vector.broadcast %90 : f32 to vector<1x512xf32>
    %92 = arith.addf %89, %91 : vector<1x512xf32>
    %cst_38 = arith.constant 0.000000e+00 : f32
    %93 = vector.broadcast %cst_38 : f32 to vector<1x512xf32>
    %94 = arith.maximumf %92, %93 : vector<1x512xf32>
    %c0_39 = arith.constant 0 : index
    %c2_40 = arith.constant 2 : index
    %95 = memref.load %arg4[%c0_39, %c2_40] : memref<1x10xf32, #tpu.memory_space<smem>>
    %96 = vector.broadcast %95 : f32 to vector<1x512xf32>
    %97 = arith.mulf %94, %96 : vector<1x512xf32>
    %98 = arith.addf %65, %97 : vector<1x512xf32>
    %99 = vector.extract_strided_slice %0 {offsets = [0, 0], sizes = [1, 512], strides = [1, 1]} : vector<5x512xf32> to vector<1x512xf32>
    %c0_41 = arith.constant 0 : index
    %c3_42 = arith.constant 3 : index
    %100 = memref.load %arg2[%c0_41, %c3_42] : memref<5x10xf32, #tpu.memory_space<smem>>
    %101 = vector.broadcast %100 : f32 to vector<1x512xf32>
    %102 = arith.mulf %99, %101 : vector<1x512xf32>
    %103 = vector.extract_strided_slice %0 {offsets = [1, 0], sizes = [1, 512], strides = [1, 1]} : vector<5x512xf32> to vector<1x512xf32>
    %c1_43 = arith.constant 1 : index
    %c3_44 = arith.constant 3 : index
    %104 = memref.load %arg2[%c1_43, %c3_44] : memref<5x10xf32, #tpu.memory_space<smem>>
    %105 = vector.broadcast %104 : f32 to vector<1x512xf32>
    %106 = arith.mulf %103, %105 : vector<1x512xf32>
    %107 = arith.addf %102, %106 : vector<1x512xf32>
    %108 = vector.extract_strided_slice %0 {offsets = [2, 0], sizes = [1, 512], strides = [1, 1]} : vector<5x512xf32> to vector<1x512xf32>
    %c2_45 = arith.constant 2 : index
    %c3_46 = arith.constant 3 : index
    %109 = memref.load %arg2[%c2_45, %c3_46] : memref<5x10xf32, #tpu.memory_space<smem>>
    %110 = vector.broadcast %109 : f32 to vector<1x512xf32>
    %111 = arith.mulf %108, %110 : vector<1x512xf32>
    %112 = arith.addf %107, %111 : vector<1x512xf32>
    %113 = vector.extract_strided_slice %0 {offsets = [3, 0], sizes = [1, 512], strides = [1, 1]} : vector<5x512xf32> to vector<1x512xf32>
    %c3_47 = arith.constant 3 : index
    %c3_48 = arith.constant 3 : index
    %114 = memref.load %arg2[%c3_47, %c3_48] : memref<5x10xf32, #tpu.memory_space<smem>>
    %115 = vector.broadcast %114 : f32 to vector<1x512xf32>
    %116 = arith.mulf %113, %115 : vector<1x512xf32>
    %117 = arith.addf %112, %116 : vector<1x512xf32>
    %118 = vector.extract_strided_slice %0 {offsets = [4, 0], sizes = [1, 512], strides = [1, 1]} : vector<5x512xf32> to vector<1x512xf32>
    %c4_49 = arith.constant 4 : index
    %c3_50 = arith.constant 3 : index
    %119 = memref.load %arg2[%c4_49, %c3_50] : memref<5x10xf32, #tpu.memory_space<smem>>
    %120 = vector.broadcast %119 : f32 to vector<1x512xf32>
    %121 = arith.mulf %118, %120 : vector<1x512xf32>
    %122 = arith.addf %117, %121 : vector<1x512xf32>
    %c0_51 = arith.constant 0 : index
    %c3_52 = arith.constant 3 : index
    %123 = memref.load %arg3[%c0_51, %c3_52] : memref<1x10xf32, #tpu.memory_space<smem>>
    %124 = vector.broadcast %123 : f32 to vector<1x512xf32>
    %125 = arith.addf %122, %124 : vector<1x512xf32>
    %cst_53 = arith.constant 0.000000e+00 : f32
    %126 = vector.broadcast %cst_53 : f32 to vector<1x512xf32>
    %127 = arith.maximumf %125, %126 : vector<1x512xf32>
    %c0_54 = arith.constant 0 : index
    %c3_55 = arith.constant 3 : index
    %128 = memref.load %arg4[%c0_54, %c3_55] : memref<1x10xf32, #tpu.memory_space<smem>>
    %129 = vector.broadcast %128 : f32 to vector<1x512xf32>
    %130 = arith.mulf %127, %129 : vector<1x512xf32>
    %131 = arith.addf %98, %130 : vector<1x512xf32>
    %132 = vector.extract_strided_slice %0 {offsets = [0, 0], sizes = [1, 512], strides = [1, 1]} : vector<5x512xf32> to vector<1x512xf32>
    %c0_56 = arith.constant 0 : index
    %c4_57 = arith.constant 4 : index
    %133 = memref.load %arg2[%c0_56, %c4_57] : memref<5x10xf32, #tpu.memory_space<smem>>
    %134 = vector.broadcast %133 : f32 to vector<1x512xf32>
    %135 = arith.mulf %132, %134 : vector<1x512xf32>
    %136 = vector.extract_strided_slice %0 {offsets = [1, 0], sizes = [1, 512], strides = [1, 1]} : vector<5x512xf32> to vector<1x512xf32>
    %c1_58 = arith.constant 1 : index
    %c4_59 = arith.constant 4 : index
    %137 = memref.load %arg2[%c1_58, %c4_59] : memref<5x10xf32, #tpu.memory_space<smem>>
    %138 = vector.broadcast %137 : f32 to vector<1x512xf32>
    %139 = arith.mulf %136, %138 : vector<1x512xf32>
    %140 = arith.addf %135, %139 : vector<1x512xf32>
    %141 = vector.extract_strided_slice %0 {offsets = [2, 0], sizes = [1, 512], strides = [1, 1]} : vector<5x512xf32> to vector<1x512xf32>
    %c2_60 = arith.constant 2 : index
    %c4_61 = arith.constant 4 : index
    %142 = memref.load %arg2[%c2_60, %c4_61] : memref<5x10xf32, #tpu.memory_space<smem>>
    %143 = vector.broadcast %142 : f32 to vector<1x512xf32>
    %144 = arith.mulf %141, %143 : vector<1x512xf32>
    %145 = arith.addf %140, %144 : vector<1x512xf32>
    %146 = vector.extract_strided_slice %0 {offsets = [3, 0], sizes = [1, 512], strides = [1, 1]} : vector<5x512xf32> to vector<1x512xf32>
    %c3_62 = arith.constant 3 : index
    %c4_63 = arith.constant 4 : index
    %147 = memref.load %arg2[%c3_62, %c4_63] : memref<5x10xf32, #tpu.memory_space<smem>>
    %148 = vector.broadcast %147 : f32 to vector<1x512xf32>
    %149 = arith.mulf %146, %148 : vector<1x512xf32>
    %150 = arith.addf %145, %149 : vector<1x512xf32>
    %151 = vector.extract_strided_slice %0 {offsets = [4, 0], sizes = [1, 512], strides = [1, 1]} : vector<5x512xf32> to vector<1x512xf32>
    %c4_64 = arith.constant 4 : index
    %c4_65 = arith.constant 4 : index
    %152 = memref.load %arg2[%c4_64, %c4_65] : memref<5x10xf32, #tpu.memory_space<smem>>
    %153 = vector.broadcast %152 : f32 to vector<1x512xf32>
    %154 = arith.mulf %151, %153 : vector<1x512xf32>
    %155 = arith.addf %150, %154 : vector<1x512xf32>
    %c0_66 = arith.constant 0 : index
    %c4_67 = arith.constant 4 : index
    %156 = memref.load %arg3[%c0_66, %c4_67] : memref<1x10xf32, #tpu.memory_space<smem>>
    %157 = vector.broadcast %156 : f32 to vector<1x512xf32>
    %158 = arith.addf %155, %157 : vector<1x512xf32>
    %cst_68 = arith.constant 0.000000e+00 : f32
    %159 = vector.broadcast %cst_68 : f32 to vector<1x512xf32>
    %160 = arith.maximumf %158, %159 : vector<1x512xf32>
    %c0_69 = arith.constant 0 : index
    %c4_70 = arith.constant 4 : index
    %161 = memref.load %arg4[%c0_69, %c4_70] : memref<1x10xf32, #tpu.memory_space<smem>>
    %162 = vector.broadcast %161 : f32 to vector<1x512xf32>
    %163 = arith.mulf %160, %162 : vector<1x512xf32>
    %164 = arith.addf %131, %163 : vector<1x512xf32>
    %165 = vector.extract_strided_slice %0 {offsets = [0, 0], sizes = [1, 512], strides = [1, 1]} : vector<5x512xf32> to vector<1x512xf32>
    %c0_71 = arith.constant 0 : index
    %c5 = arith.constant 5 : index
    %166 = memref.load %arg2[%c0_71, %c5] : memref<5x10xf32, #tpu.memory_space<smem>>
    %167 = vector.broadcast %166 : f32 to vector<1x512xf32>
    %168 = arith.mulf %165, %167 : vector<1x512xf32>
    %169 = vector.extract_strided_slice %0 {offsets = [1, 0], sizes = [1, 512], strides = [1, 1]} : vector<5x512xf32> to vector<1x512xf32>
    %c1_72 = arith.constant 1 : index
    %c5_73 = arith.constant 5 : index
    %170 = memref.load %arg2[%c1_72, %c5_73] : memref<5x10xf32, #tpu.memory_space<smem>>
    %171 = vector.broadcast %170 : f32 to vector<1x512xf32>
    %172 = arith.mulf %169, %171 : vector<1x512xf32>
    %173 = arith.addf %168, %172 : vector<1x512xf32>
    %174 = vector.extract_strided_slice %0 {offsets = [2, 0], sizes = [1, 512], strides = [1, 1]} : vector<5x512xf32> to vector<1x512xf32>
    %c2_74 = arith.constant 2 : index
    %c5_75 = arith.constant 5 : index
    %175 = memref.load %arg2[%c2_74, %c5_75] : memref<5x10xf32, #tpu.memory_space<smem>>
    %176 = vector.broadcast %175 : f32 to vector<1x512xf32>
    %177 = arith.mulf %174, %176 : vector<1x512xf32>
    %178 = arith.addf %173, %177 : vector<1x512xf32>
    %179 = vector.extract_strided_slice %0 {offsets = [3, 0], sizes = [1, 512], strides = [1, 1]} : vector<5x512xf32> to vector<1x512xf32>
    %c3_76 = arith.constant 3 : index
    %c5_77 = arith.constant 5 : index
    %180 = memref.load %arg2[%c3_76, %c5_77] : memref<5x10xf32, #tpu.memory_space<smem>>
    %181 = vector.broadcast %180 : f32 to vector<1x512xf32>
    %182 = arith.mulf %179, %181 : vector<1x512xf32>
    %183 = arith.addf %178, %182 : vector<1x512xf32>
    %184 = vector.extract_strided_slice %0 {offsets = [4, 0], sizes = [1, 512], strides = [1, 1]} : vector<5x512xf32> to vector<1x512xf32>
    %c4_78 = arith.constant 4 : index
    %c5_79 = arith.constant 5 : index
    %185 = memref.load %arg2[%c4_78, %c5_79] : memref<5x10xf32, #tpu.memory_space<smem>>
    %186 = vector.broadcast %185 : f32 to vector<1x512xf32>
    %187 = arith.mulf %184, %186 : vector<1x512xf32>
    %188 = arith.addf %183, %187 : vector<1x512xf32>
    %c0_80 = arith.constant 0 : index
    %c5_81 = arith.constant 5 : index
    %189 = memref.load %arg3[%c0_80, %c5_81] : memref<1x10xf32, #tpu.memory_space<smem>>
    %190 = vector.broadcast %189 : f32 to vector<1x512xf32>
    %191 = arith.addf %188, %190 : vector<1x512xf32>
    %cst_82 = arith.constant 0.000000e+00 : f32
    %192 = vector.broadcast %cst_82 : f32 to vector<1x512xf32>
    %193 = arith.maximumf %191, %192 : vector<1x512xf32>
    %c0_83 = arith.constant 0 : index
    %c5_84 = arith.constant 5 : index
    %194 = memref.load %arg4[%c0_83, %c5_84] : memref<1x10xf32, #tpu.memory_space<smem>>
    %195 = vector.broadcast %194 : f32 to vector<1x512xf32>
    %196 = arith.mulf %193, %195 : vector<1x512xf32>
    %197 = arith.addf %164, %196 : vector<1x512xf32>
    %198 = vector.extract_strided_slice %0 {offsets = [0, 0], sizes = [1, 512], strides = [1, 1]} : vector<5x512xf32> to vector<1x512xf32>
    %c0_85 = arith.constant 0 : index
    %c6 = arith.constant 6 : index
    %199 = memref.load %arg2[%c0_85, %c6] : memref<5x10xf32, #tpu.memory_space<smem>>
    %200 = vector.broadcast %199 : f32 to vector<1x512xf32>
    %201 = arith.mulf %198, %200 : vector<1x512xf32>
    %202 = vector.extract_strided_slice %0 {offsets = [1, 0], sizes = [1, 512], strides = [1, 1]} : vector<5x512xf32> to vector<1x512xf32>
    %c1_86 = arith.constant 1 : index
    %c6_87 = arith.constant 6 : index
    %203 = memref.load %arg2[%c1_86, %c6_87] : memref<5x10xf32, #tpu.memory_space<smem>>
    %204 = vector.broadcast %203 : f32 to vector<1x512xf32>
    %205 = arith.mulf %202, %204 : vector<1x512xf32>
    %206 = arith.addf %201, %205 : vector<1x512xf32>
    %207 = vector.extract_strided_slice %0 {offsets = [2, 0], sizes = [1, 512], strides = [1, 1]} : vector<5x512xf32> to vector<1x512xf32>
    %c2_88 = arith.constant 2 : index
    %c6_89 = arith.constant 6 : index
    %208 = memref.load %arg2[%c2_88, %c6_89] : memref<5x10xf32, #tpu.memory_space<smem>>
    %209 = vector.broadcast %208 : f32 to vector<1x512xf32>
    %210 = arith.mulf %207, %209 : vector<1x512xf32>
    %211 = arith.addf %206, %210 : vector<1x512xf32>
    %212 = vector.extract_strided_slice %0 {offsets = [3, 0], sizes = [1, 512], strides = [1, 1]} : vector<5x512xf32> to vector<1x512xf32>
    %c3_90 = arith.constant 3 : index
    %c6_91 = arith.constant 6 : index
    %213 = memref.load %arg2[%c3_90, %c6_91] : memref<5x10xf32, #tpu.memory_space<smem>>
    %214 = vector.broadcast %213 : f32 to vector<1x512xf32>
    %215 = arith.mulf %212, %214 : vector<1x512xf32>
    %216 = arith.addf %211, %215 : vector<1x512xf32>
    %217 = vector.extract_strided_slice %0 {offsets = [4, 0], sizes = [1, 512], strides = [1, 1]} : vector<5x512xf32> to vector<1x512xf32>
    %c4_92 = arith.constant 4 : index
    %c6_93 = arith.constant 6 : index
    %218 = memref.load %arg2[%c4_92, %c6_93] : memref<5x10xf32, #tpu.memory_space<smem>>
    %219 = vector.broadcast %218 : f32 to vector<1x512xf32>
    %220 = arith.mulf %217, %219 : vector<1x512xf32>
    %221 = arith.addf %216, %220 : vector<1x512xf32>
    %c0_94 = arith.constant 0 : index
    %c6_95 = arith.constant 6 : index
    %222 = memref.load %arg3[%c0_94, %c6_95] : memref<1x10xf32, #tpu.memory_space<smem>>
    %223 = vector.broadcast %222 : f32 to vector<1x512xf32>
    %224 = arith.addf %221, %223 : vector<1x512xf32>
    %cst_96 = arith.constant 0.000000e+00 : f32
    %225 = vector.broadcast %cst_96 : f32 to vector<1x512xf32>
    %226 = arith.maximumf %224, %225 : vector<1x512xf32>
    %c0_97 = arith.constant 0 : index
    %c6_98 = arith.constant 6 : index
    %227 = memref.load %arg4[%c0_97, %c6_98] : memref<1x10xf32, #tpu.memory_space<smem>>
    %228 = vector.broadcast %227 : f32 to vector<1x512xf32>
    %229 = arith.mulf %226, %228 : vector<1x512xf32>
    %230 = arith.addf %197, %229 : vector<1x512xf32>
    %231 = vector.extract_strided_slice %0 {offsets = [0, 0], sizes = [1, 512], strides = [1, 1]} : vector<5x512xf32> to vector<1x512xf32>
    %c0_99 = arith.constant 0 : index
    %c7 = arith.constant 7 : index
    %232 = memref.load %arg2[%c0_99, %c7] : memref<5x10xf32, #tpu.memory_space<smem>>
    %233 = vector.broadcast %232 : f32 to vector<1x512xf32>
    %234 = arith.mulf %231, %233 : vector<1x512xf32>
    %235 = vector.extract_strided_slice %0 {offsets = [1, 0], sizes = [1, 512], strides = [1, 1]} : vector<5x512xf32> to vector<1x512xf32>
    %c1_100 = arith.constant 1 : index
    %c7_101 = arith.constant 7 : index
    %236 = memref.load %arg2[%c1_100, %c7_101] : memref<5x10xf32, #tpu.memory_space<smem>>
    %237 = vector.broadcast %236 : f32 to vector<1x512xf32>
    %238 = arith.mulf %235, %237 : vector<1x512xf32>
    %239 = arith.addf %234, %238 : vector<1x512xf32>
    %240 = vector.extract_strided_slice %0 {offsets = [2, 0], sizes = [1, 512], strides = [1, 1]} : vector<5x512xf32> to vector<1x512xf32>
    %c2_102 = arith.constant 2 : index
    %c7_103 = arith.constant 7 : index
    %241 = memref.load %arg2[%c2_102, %c7_103] : memref<5x10xf32, #tpu.memory_space<smem>>
    %242 = vector.broadcast %241 : f32 to vector<1x512xf32>
    %243 = arith.mulf %240, %242 : vector<1x512xf32>
    %244 = arith.addf %239, %243 : vector<1x512xf32>
    %245 = vector.extract_strided_slice %0 {offsets = [3, 0], sizes = [1, 512], strides = [1, 1]} : vector<5x512xf32> to vector<1x512xf32>
    %c3_104 = arith.constant 3 : index
    %c7_105 = arith.constant 7 : index
    %246 = memref.load %arg2[%c3_104, %c7_105] : memref<5x10xf32, #tpu.memory_space<smem>>
    %247 = vector.broadcast %246 : f32 to vector<1x512xf32>
    %248 = arith.mulf %245, %247 : vector<1x512xf32>
    %249 = arith.addf %244, %248 : vector<1x512xf32>
    %250 = vector.extract_strided_slice %0 {offsets = [4, 0], sizes = [1, 512], strides = [1, 1]} : vector<5x512xf32> to vector<1x512xf32>
    %c4_106 = arith.constant 4 : index
    %c7_107 = arith.constant 7 : index
    %251 = memref.load %arg2[%c4_106, %c7_107] : memref<5x10xf32, #tpu.memory_space<smem>>
    %252 = vector.broadcast %251 : f32 to vector<1x512xf32>
    %253 = arith.mulf %250, %252 : vector<1x512xf32>
    %254 = arith.addf %249, %253 : vector<1x512xf32>
    %c0_108 = arith.constant 0 : index
    %c7_109 = arith.constant 7 : index
    %255 = memref.load %arg3[%c0_108, %c7_109] : memref<1x10xf32, #tpu.memory_space<smem>>
    %256 = vector.broadcast %255 : f32 to vector<1x512xf32>
    %257 = arith.addf %254, %256 : vector<1x512xf32>
    %cst_110 = arith.constant 0.000000e+00 : f32
    %258 = vector.broadcast %cst_110 : f32 to vector<1x512xf32>
    %259 = arith.maximumf %257, %258 : vector<1x512xf32>
    %c0_111 = arith.constant 0 : index
    %c7_112 = arith.constant 7 : index
    %260 = memref.load %arg4[%c0_111, %c7_112] : memref<1x10xf32, #tpu.memory_space<smem>>
    %261 = vector.broadcast %260 : f32 to vector<1x512xf32>
    %262 = arith.mulf %259, %261 : vector<1x512xf32>
    %263 = arith.addf %230, %262 : vector<1x512xf32>
    %264 = vector.extract_strided_slice %0 {offsets = [0, 0], sizes = [1, 512], strides = [1, 1]} : vector<5x512xf32> to vector<1x512xf32>
    %c0_113 = arith.constant 0 : index
    %c8 = arith.constant 8 : index
    %265 = memref.load %arg2[%c0_113, %c8] : memref<5x10xf32, #tpu.memory_space<smem>>
    %266 = vector.broadcast %265 : f32 to vector<1x512xf32>
    %267 = arith.mulf %264, %266 : vector<1x512xf32>
    %268 = vector.extract_strided_slice %0 {offsets = [1, 0], sizes = [1, 512], strides = [1, 1]} : vector<5x512xf32> to vector<1x512xf32>
    %c1_114 = arith.constant 1 : index
    %c8_115 = arith.constant 8 : index
    %269 = memref.load %arg2[%c1_114, %c8_115] : memref<5x10xf32, #tpu.memory_space<smem>>
    %270 = vector.broadcast %269 : f32 to vector<1x512xf32>
    %271 = arith.mulf %268, %270 : vector<1x512xf32>
    %272 = arith.addf %267, %271 : vector<1x512xf32>
    %273 = vector.extract_strided_slice %0 {offsets = [2, 0], sizes = [1, 512], strides = [1, 1]} : vector<5x512xf32> to vector<1x512xf32>
    %c2_116 = arith.constant 2 : index
    %c8_117 = arith.constant 8 : index
    %274 = memref.load %arg2[%c2_116, %c8_117] : memref<5x10xf32, #tpu.memory_space<smem>>
    %275 = vector.broadcast %274 : f32 to vector<1x512xf32>
    %276 = arith.mulf %273, %275 : vector<1x512xf32>
    %277 = arith.addf %272, %276 : vector<1x512xf32>
    %278 = vector.extract_strided_slice %0 {offsets = [3, 0], sizes = [1, 512], strides = [1, 1]} : vector<5x512xf32> to vector<1x512xf32>
    %c3_118 = arith.constant 3 : index
    %c8_119 = arith.constant 8 : index
    %279 = memref.load %arg2[%c3_118, %c8_119] : memref<5x10xf32, #tpu.memory_space<smem>>
    %280 = vector.broadcast %279 : f32 to vector<1x512xf32>
    %281 = arith.mulf %278, %280 : vector<1x512xf32>
    %282 = arith.addf %277, %281 : vector<1x512xf32>
    %283 = vector.extract_strided_slice %0 {offsets = [4, 0], sizes = [1, 512], strides = [1, 1]} : vector<5x512xf32> to vector<1x512xf32>
    %c4_120 = arith.constant 4 : index
    %c8_121 = arith.constant 8 : index
    %284 = memref.load %arg2[%c4_120, %c8_121] : memref<5x10xf32, #tpu.memory_space<smem>>
    %285 = vector.broadcast %284 : f32 to vector<1x512xf32>
    %286 = arith.mulf %283, %285 : vector<1x512xf32>
    %287 = arith.addf %282, %286 : vector<1x512xf32>
    %c0_122 = arith.constant 0 : index
    %c8_123 = arith.constant 8 : index
    %288 = memref.load %arg3[%c0_122, %c8_123] : memref<1x10xf32, #tpu.memory_space<smem>>
    %289 = vector.broadcast %288 : f32 to vector<1x512xf32>
    %290 = arith.addf %287, %289 : vector<1x512xf32>
    %cst_124 = arith.constant 0.000000e+00 : f32
    %291 = vector.broadcast %cst_124 : f32 to vector<1x512xf32>
    %292 = arith.maximumf %290, %291 : vector<1x512xf32>
    %c0_125 = arith.constant 0 : index
    %c8_126 = arith.constant 8 : index
    %293 = memref.load %arg4[%c0_125, %c8_126] : memref<1x10xf32, #tpu.memory_space<smem>>
    %294 = vector.broadcast %293 : f32 to vector<1x512xf32>
    %295 = arith.mulf %292, %294 : vector<1x512xf32>
    %296 = arith.addf %263, %295 : vector<1x512xf32>
    %297 = vector.extract_strided_slice %0 {offsets = [0, 0], sizes = [1, 512], strides = [1, 1]} : vector<5x512xf32> to vector<1x512xf32>
    %c0_127 = arith.constant 0 : index
    %c9 = arith.constant 9 : index
    %298 = memref.load %arg2[%c0_127, %c9] : memref<5x10xf32, #tpu.memory_space<smem>>
    %299 = vector.broadcast %298 : f32 to vector<1x512xf32>
    %300 = arith.mulf %297, %299 : vector<1x512xf32>
    %301 = vector.extract_strided_slice %0 {offsets = [1, 0], sizes = [1, 512], strides = [1, 1]} : vector<5x512xf32> to vector<1x512xf32>
    %c1_128 = arith.constant 1 : index
    %c9_129 = arith.constant 9 : index
    %302 = memref.load %arg2[%c1_128, %c9_129] : memref<5x10xf32, #tpu.memory_space<smem>>
    %303 = vector.broadcast %302 : f32 to vector<1x512xf32>
    %304 = arith.mulf %301, %303 : vector<1x512xf32>
    %305 = arith.addf %300, %304 : vector<1x512xf32>
    %306 = vector.extract_strided_slice %0 {offsets = [2, 0], sizes = [1, 512], strides = [1, 1]} : vector<5x512xf32> to vector<1x512xf32>
    %c2_130 = arith.constant 2 : index
    %c9_131 = arith.constant 9 : index
    %307 = memref.load %arg2[%c2_130, %c9_131] : memref<5x10xf32, #tpu.memory_space<smem>>
    %308 = vector.broadcast %307 : f32 to vector<1x512xf32>
    %309 = arith.mulf %306, %308 : vector<1x512xf32>
    %310 = arith.addf %305, %309 : vector<1x512xf32>
    %311 = vector.extract_strided_slice %0 {offsets = [3, 0], sizes = [1, 512], strides = [1, 1]} : vector<5x512xf32> to vector<1x512xf32>
    %c3_132 = arith.constant 3 : index
    %c9_133 = arith.constant 9 : index
    %312 = memref.load %arg2[%c3_132, %c9_133] : memref<5x10xf32, #tpu.memory_space<smem>>
    %313 = vector.broadcast %312 : f32 to vector<1x512xf32>
    %314 = arith.mulf %311, %313 : vector<1x512xf32>
    %315 = arith.addf %310, %314 : vector<1x512xf32>
    %316 = vector.extract_strided_slice %0 {offsets = [4, 0], sizes = [1, 512], strides = [1, 1]} : vector<5x512xf32> to vector<1x512xf32>
    %c4_134 = arith.constant 4 : index
    %c9_135 = arith.constant 9 : index
    %317 = memref.load %arg2[%c4_134, %c9_135] : memref<5x10xf32, #tpu.memory_space<smem>>
    %318 = vector.broadcast %317 : f32 to vector<1x512xf32>
    %319 = arith.mulf %316, %318 : vector<1x512xf32>
    %320 = arith.addf %315, %319 : vector<1x512xf32>
    %c0_136 = arith.constant 0 : index
    %c9_137 = arith.constant 9 : index
    %321 = memref.load %arg3[%c0_136, %c9_137] : memref<1x10xf32, #tpu.memory_space<smem>>
    %322 = vector.broadcast %321 : f32 to vector<1x512xf32>
    %323 = arith.addf %320, %322 : vector<1x512xf32>
    %cst_138 = arith.constant 0.000000e+00 : f32
    %324 = vector.broadcast %cst_138 : f32 to vector<1x512xf32>
    %325 = arith.maximumf %323, %324 : vector<1x512xf32>
    %c0_139 = arith.constant 0 : index
    %c9_140 = arith.constant 9 : index
    %326 = memref.load %arg4[%c0_139, %c9_140] : memref<1x10xf32, #tpu.memory_space<smem>>
    %327 = vector.broadcast %326 : f32 to vector<1x512xf32>
    %328 = arith.mulf %325, %327 : vector<1x512xf32>
    %329 = arith.addf %296, %328 : vector<1x512xf32>
    %c0_141 = arith.constant 0 : index
    %c0_142 = arith.constant 0 : index
    %330 = memref.load %arg5[%c0_141, %c0_142] : memref<1x1xf32, #tpu.memory_space<smem>>
    %331 = vector.broadcast %330 : f32 to vector<1x512xf32>
    %332 = arith.addf %329, %331 : vector<1x512xf32>
    %c0_143 = arith.constant 0 : index
    %c0_144 = arith.constant 0 : index
    %333 = vector.load %arg6[%c0_143, %c0_144] : memref<1x512xf32, #tpu.memory_space<vmem>>, vector<1x512xf32>
    tpu.vector_store %arg6[%c0_143, %c0_144], %332 {strides = array<i32>} : memref<1x512xf32, #tpu.memory_space<vmem>>, vector<1x512xf32>,
    return
  }
  func.func @transform_0(%arg0: i32) -> (i32, i32) {
    %c0_i32 = arith.constant 0 : i32
    %c0_i32_0 = arith.constant 0 : i32
    return %c0_i32, %arg0 : i32, i32
  }
  func.func @transform_1(%arg0: i32) -> (i32, i32) {
    %c0_i32 = arith.constant 0 : i32
    %c0_i32_0 = arith.constant 0 : i32
    %c0_i32_1 = arith.constant 0 : i32
    return %c0_i32, %c0_i32_0 : i32, i32
  }
  func.func @transform_2(%arg0: i32) -> (i32, i32) {
    %c0_i32 = arith.constant 0 : i32
    %c0_i32_0 = arith.constant 0 : i32
    %c0_i32_1 = arith.constant 0 : i32
    return %c0_i32, %c0_i32_0 : i32, i32
  }
  func.func @transform_3(%arg0: i32) -> (i32, i32) {
    %c0_i32 = arith.constant 0 : i32
    %c0_i32_0 = arith.constant 0 : i32
    %c0_i32_1 = arith.constant 0 : i32
    return %c0_i32, %c0_i32_0 : i32, i32
  }
  func.func @transform_4(%arg0: i32) -> (i32, i32) {
    %c0_i32 = arith.constant 0 : i32
    %c0_i32_0 = arith.constant 0 : i32
    %c0_i32_1 = arith.constant 0 : i32
    return %c0_i32, %c0_i32_0 : i32, i32
  }
  func.func @transform_5(%arg0: i32) -> (i32, i32) {
    %c0_i32 = arith.constant 0 : i32
    %c0_i32_0 = arith.constant 0 : i32
    return %c0_i32, %arg0 : i32, i32
  }
}

</mosaic_0001>

<bundles_post_ra>
// kernel: tpu_custom_call.1
= control target key start
LH: loop header
LB: loop body
LE: loop exit
PB: predicated region body
PF: predicated region fallthrough
CT: control target
= control target key end

     0   :  { %11 = vsyncpa [#allocation4], 0  ;;  %s2103_s0 = inlined_call_operand.hbm [shape: f32[5,512], index: 0, kind: input, shape index: {}]   ;;  %s2104_s1 = inlined_call_operand.hbm [shape: f32[5,10], index: 1, kind: input, shape index: {}]   ;;  %s2105_s2 = inlined_call_operand.vmem [shape: f32[1,10], index: 2, kind: input, shape index: {}]   ;;  %s2106_s3 = inlined_call_operand.vmem [shape: f32[1,10], index: 3, kind: input, shape index: {}]   ;;  %s2107_s4 = inlined_call_operand.<no memory space> [shape: f32[1,1], index: 4, kind: input, shape index: {}]   ;;  %s2108_s5 = inlined_call_operand.hbm [shape: f32[1,512], index: 5, kind: output, shape index: {}]  }
   0x1   :  { %12 = vsyncpa [#allocation6], 0 }
   0x2   :  { %13 = vsyncpa [#allocation7], 0 }
   0x3   :  { %14 = vsyncpa [#allocation11], 0 }
   0x4   :  { %15 = vsyncpa [#allocation5], 0  ;;  %s1432_s18 = smov [#allocation3]   ;;  %s40_s22 = sshll.u32 %s2105_s2, 4  ;;  %s1471_s22 = int_to_ptr.vmem [resolvable:$true] %s40_s22 }
   0x5   :  { %s22_s19 = sshll.u32 %s1432_s18, 4  ;;  %s1344_s25 = scalar_lea.hbm %s2103_s0, 512  ;;  %s23_s19 = int_to_ptr.vmem [resolvable:$true] %s22_s19 }
   0x6   :  { %p1345_p0 = scmp.ne.s32.totalorder %s2103_s0, %s1344_s25  ;;  %p1348_p1 = scmp.lt.u32.totalorder %s1344_s25, %s2103_s0 }
   0x8   :  { %p1350_p2 = pnand %p1348_p1, %p1345_p0 }
   0xa   :  { %1353 = shalt.err (!%p1350_p2)
}
   0xb   :  { %s1354_s30 = scalar_lea.vmem %s23_s19, 512  ;;  %p1359_p4 = scmp.lt.s32.totalorder %s23_s19, %s23_s19 }
   0xc   :  { %p1355_p3 = scmp.ne.s32.totalorder %s23_s19, %s1354_s30  ;;  %p1360_p5 = scmp.lt.s32.totalorder %s1354_s30, %s1354_s30 }
   0xe   :  { %p1361_p6 = por %p1360_p5, %p1359_p4 }
  0x10   :  { %p1362_p7 = pnand %p1361_p6, %p1355_p3 }
  0x12   :  { %1365 = shalt.err (!%p1362_p7)
}
  0x13   :  { %25 = dma.hbm_to_vmem [thread:$0]  %s2103_s0, 512, %s23_s19, [#allocation4]  }
  0x14   :  { %s1366_s9 = scalar_lea.hbm %s2104_s1, 128 }
  0x15   :  { %p1367_p8 = scmp.ne.s32.totalorder %s2104_s1, %s1366_s9  ;;  %p1370_p9 = scmp.lt.u32.totalorder %s1366_s9, %s2104_s1 }
  0x17   :  { %p1372_p10 = pnand %p1370_p9, %p1367_p8 }
  0x19   :  { %1375 = shalt.err (!%p1372_p10)
}
  0x1a   :  { %s1433_s14 = smov [#allocation8]   ;;  %s50_s18 = sshll.u32 %s2106_s3, 4  ;;  %s51_s18 = int_to_ptr.vmem [resolvable:$true] %s50_s18 }
  0x1b   :  { %33 = dma.hbm_to_smem %s2104_s1, 128, %s1433_s14, [#allocation6]  }
  0x1c   :  { %s1376_s19 = scalar_lea.vmem %s1471_s22, 16  ;;  %p1381_p12 = scmp.lt.s32.totalorder %s1471_s22, %s1471_s22 }
  0x1d   :  { %p1377_p11 = scmp.ne.s32.totalorder %s1471_s22, %s1376_s19  ;;  %p1382_p13 = scmp.lt.s32.totalorder %s1376_s19, %s1376_s19 }
  0x1f   :  { %p1383_p0 = por %p1382_p13, %p1381_p12 }
  0x21   :  { %p1384_p1 = pnand %p1383_p0, %p1377_p11 }
  0x23   :  { %1387 = shalt.err (!%p1384_p1)
}
  0x24   :  { %s1434_s20 = smov [#allocation9]   ;;  %s1388_s21 = scalar_lea.vmem %s51_s18, 16 }
  0x25   :  { %43 = dma.vmem_to_smem %s1471_s22, 16, %s1434_s20, [#allocation7]  }
  0x26   :  { %p1389_p2 = scmp.ne.s32.totalorder %s51_s18, %s1388_s21  ;;  %p1393_p3 = scmp.lt.s32.totalorder %s51_s18, %s51_s18 }
  0x27   :  { %p1394_p4 = scmp.lt.s32.totalorder %s1388_s21, %s1388_s21 }
  0x29   :  { %p1395_p5 = por %p1394_p4, %p1393_p3 }
  0x2b   :  { %p1396_p6 = pnand %p1395_p5, %p1389_p2 }
  0x2d   :  { %1399 = shalt.err (!%p1396_p6)
}
  0x2e   :  { %s1435_s1 = smov [#allocation10]  }
  0x2f   :  { %53 = dma.vmem_to_smem %s51_s18, 16, %s1435_s1, [#allocation11]  }
  0x30   :  { %1422 = dma.done.wait [#allocation4], 512  }
  0x31   :  { %1423 = vsyncadd [#allocation4], 4294966784 }
  0x32   :  { %1424 = dma.done.wait [#allocation6], 128  }
  0x33   :  { %1425 = vsyncadd [#allocation6], 4294967168 }
  0x34   :  { %1426 = dma.done.wait [#allocation7], 16  }
  0x35   :  { %1427 = vsyncadd [#allocation7], 4294967280 }
  0x36   :  { %1428 = dma.done.wait [#allocation11], 16  }
  0x37   :  { %1429 = vsyncadd [#allocation11], 4294967280 }
  0x38   :  { %68 = sfence }
  0x39   :  { %s73_s3 = sld [smem:[#allocation8]]  ;;  %v1505_v0 = vld [vmem:[#allocation3] sm:$0x1f]  ;;  %v1507_v1 = vld [vmem:[#allocation3 + $0x8] sm:$0x1f]  ;;  %s1525_s26 = sld [smem:[#allocation8 + $0x1]] }
  0x3a   :  { %s1267_s22 = sld [smem:[#allocation8 + $0x80]]  ;;  %v1509_v2 = vld [vmem:[#allocation3 + $0x10] sm:$0x1f]  ;;  %v1511_v3 = vld [vmem:[#allocation3 + $0x18] sm:$0x1f]  ;;  %s1527_s27 = sld [smem:[#allocation8 + $0x81]] }
  0x3b   :  { %s1268_s23 = sld [smem:[#allocation8 + $0x100]]  ;;  %s1273_s29 = sld [smem:[#allocation8 + $0x101]] }
  0x3c   :  { %s1269_s24 = sld [smem:[#allocation8 + $0x180]]  ;;  %s1539_s2 = sld [smem:[#allocation8 + $0x181]] }
  0x3d   :  { %s1270_s25 = sld [smem:[#allocation8 + $0x200]]  ;;  %s1541_s6 = sld [smem:[#allocation8 + $0x201]] }
  0x3e   :  { %s167_s28 = sld [smem:[#allocation9]]  ;;  %s1565_s7 = sld [smem:[#allocation9 + $0x1]] }
  0x3f   :  { %v74_v4 = vstv %s73_s3  ;;  %s177_s30 = sld [smem:[#allocation10]]  ;;  %v184_v57 = vstv %s1525_s26  ;;  %s1571_s8 = sld [smem:[#allocation8 + $0x2]] }
  0x40   :  { %v80_v5 = vstv %s1267_s22  ;;  %v75_v6 = vmul.f32 %v74_v4, %v1505_v0  ;;  %v76_v7 = vmul.f32 %v74_v4, %v1507_v1  ;;  %v77_v8 = vmul.f32 %v74_v4, %v1509_v2  ;;  %s1573_s9 = sld [smem:[#allocation8 + $0x82]]  ;;  %s1579_s10 = sld [smem:[#allocation10 + $0x1]] }
  0x41   :  { %v78_v9 = vmul.f32 %v74_v4, %v1511_v3  ;;  %v81_v10 = vmul.f32 %v80_v5, %v1505_v0  ;;  %v82_v11 = vmul.f32 %v80_v5, %v1507_v1  ;;  %v83_v12 = vmul.f32 %v80_v5, %v1509_v2  ;;  %s1585_s11 = sld [smem:[#allocation8 + $0x102]]  ;;  %s1619_s14 = sld [smem:[#allocation8 + $0x3]] }
  0x42   :  { %v84_v13 = vmul.f32 %v80_v5, %v1511_v3  ;;  %v102_v14 = vstv %s1268_s23  ;;  %v124_v15 = vstv %s1269_s24  ;;  %v190_v60 = vstv %s1527_s27  ;;  %s1587_s12 = sld [smem:[#allocation8 + $0x182]]  ;;  %s1635_s16 = sld [smem:[#allocation8 + $0x83]] }
  0x43   :  { %v146_v16 = vstv %s1270_s25  ;;  %v89_v17 = vrot.slane %v81_v10, 1  ;;  %v90_v18 = vrot.slane %v82_v11, 1  ;;  %v91_v19 = vrot.slane %v83_v12, 1  ;;  %s1617_s13 = sld [smem:[#allocation8 + $0x202]]  ;;  %s1645_s0 = sld [smem:[#allocation8 + $0x103]] }
  0x44   :  { %v92_v20 = vrot.slane %v84_v13, 1  ;;  %v103_v21 = vmul.f32 %v102_v14, %v1505_v0  ;;  %v104_v22 = vmul.f32 %v102_v14, %v1507_v1  ;;  %v105_v23 = vmul.f32 %v102_v14, %v1509_v2  ;;  %s1633_s15 = sld [smem:[#allocation9 + $0x2]]  ;;  %s1661_s18 = sld [smem:[#allocation8 + $0x183]] }
  0x45   :  { %v106_v24 = vmul.f32 %v102_v14, %v1511_v3  ;;  %v97_v25 = vadd.f32 %v89_v17, %v75_v6  ;;  %v98_v26 = vadd.f32 %v90_v18, %v76_v7  ;;  %v99_v27 = vadd.f32 %v91_v19, %v77_v8  ;;  %s1651_s17 = sld [smem:[#allocation10 + $0x2]]  ;;  %s1663_s19 = sld [smem:[#allocation8 + $0x203]] }
  0x46   :  { %v100_v28 = vadd.f32 %v92_v20, %v78_v9  ;;  %v111_v29 = vrot.slane %v103_v21, 2  ;;  %v112_v30 = vrot.slane %v104_v22, 2  ;;  %v113_v31 = vrot.slane %v105_v23, 2  ;;  %s1689_s20 = sld [smem:[#allocation9 + $0x3]]  ;;  %s1691_s21 = sld [smem:[#allocation8 + $0x4]] }
  0x47   :  { %v114_v32 = vrot.slane %v106_v24, 2  ;;  %v125_v33 = vmul.f32 %v124_v15, %v1505_v0  ;;  %v126_v34 = vmul.f32 %v124_v15, %v1507_v1  ;;  %v127_v35 = vmul.f32 %v124_v15, %v1509_v2  ;;  %s1697_s1 = sld [smem:[#allocation8 + $0x84]]  ;;  %s1703_s3 = sld [smem:[#allocation10 + $0x3]] }
  0x48   :  { %v128_v36 = vmul.f32 %v124_v15, %v1511_v3  ;;  %v119_v37 = vadd.f32 %v111_v29, %v97_v25  ;;  %v120_v38 = vadd.f32 %v112_v30, %v98_v26  ;;  %v121_v39 = vadd.f32 %v113_v31, %v99_v27  ;;  %s1713_s22 = sld [smem:[#allocation8 + $0x104]]  ;;  %s1759_s26 = sld [smem:[#allocation8 + $0x85]] }
  0x49   :  { %v122_v40 = vadd.f32 %v114_v32, %v100_v28  ;;  %v133_v41 = vrot.slane %v125_v33, 3  ;;  %v134_v42 = vrot.slane %v126_v34, 3  ;;  %v135_v43 = vrot.slane %v127_v35, 3  ;;  %s1721_s23 = sld [smem:[#allocation8 + $0x184]]  ;;  %s1765_s27 = sld [smem:[#allocation8 + $0x5]] }
  0x4a   :  { %v136_v44 = vrot.slane %v128_v36, 3  ;;  %v147_v45 = vmul.f32 %v146_v16, %v1505_v0  ;;  %v148_v46 = vmul.f32 %v146_v16, %v1507_v1  ;;  %v149_v47 = vmul.f32 %v146_v16, %v1509_v2  ;;  %s1723_s24 = sld [smem:[#allocation8 + $0x204]] }
  0x4b   :  { %v150_v48 = vmul.f32 %v146_v16, %v1511_v3  ;;  %v141_v49 = vadd.f32 %v133_v41, %v119_v37  ;;  %v142_v50 = vadd.f32 %v134_v42, %v120_v38  ;;  %v143_v51 = vadd.f32 %v135_v43, %v121_v39  ;;  %s1757_s25 = sld [smem:[#allocation9 + $0x4]] }
  0x4c   :  { %v144_v52 = vadd.f32 %v136_v44, %v122_v40  ;;  %v155_v53 = vrot.slane %v147_v45, 4  ;;  %v156_v54 = vrot.slane %v148_v46, 4  ;;  %v157_v55 = vrot.slane %v149_v47, 4 }
  0x4d   :  { %v158_v56 = vrot.slane %v150_v48, 4  ;;  %v168_v63 = vstv %s167_s28  ;;  %v185_v4 = vmul.f32 %v184_v57, %v1505_v0  ;;  %v186_v5 = vmul.f32 %v184_v57, %v1507_v1  ;;  %s1771_s28 = sld [smem:[#allocation8 + $0x105]] }
  0x4e   :  { %v163_v58 = vadd.f32 %v155_v53, %v141_v49  ;;  %v164_v59 = vadd.f32 %v156_v54, %v142_v50  ;;  %v165_v61 = vadd.f32 %v157_v55, %v143_v51  ;;  %v187_v6 = vmul.f32 %v184_v57, %v1509_v2 }
  0x4f   :  { %v166_v62 = vadd.f32 %v158_v56, %v144_v52  ;;  %v188_v7 = vmul.f32 %v184_v57, %v1511_v3  ;;  %v191_v8 = vmul.f32 %v190_v60, %v1505_v0  ;;  %v192_v9 = vmul.f32 %v190_v60, %v1507_v1 }
  0x50   :  { %v193_v10 = vmul.f32 %v190_v60, %v1509_v2  ;;  %v194_v11 = vmul.f32 %v190_v60, %v1511_v3  ;;  %v1551_v12 = vadd.f32 %v168_v63, %v163_v58  ;;  %v1553_v13 = vadd.f32 %v168_v63, %v164_v59 }
  0x51   :  { %v212_v14 = vstv %s1273_s29  ;;  %v199_v15 = vrot.slane %v191_v8, 1  ;;  %v200_v16 = vrot.slane %v192_v9, 1  ;;  %v1555_v19 = vadd.f32 %v168_v63, %v165_v61  ;;  %s1775_s29 = sld [smem:[#allocation10 + $0x4]] }
  0x52   :  { %v201_v17 = vrot.slane %v193_v10, 1  ;;  %v202_v18 = vrot.slane %v194_v11, 1  ;;  %v1557_v20 = vadd.f32 %v168_v63, %v166_v62  ;;  %v1559_v21 = vstv %s177_s30  ;;  %s1788_s30 = sld [smem:[#allocation8 + $0x185]] }
  0x53   :  { %v207_v22 = vadd.f32 %v199_v15, %v185_v4  ;;  %v208_v23 = vadd.f32 %v200_v16, %v186_v5  ;;  %v213_v26 = vmul.f32 %v212_v14, %v1505_v0  ;;  %v214_v27 = vmul.f32 %v212_v14, %v1507_v1 }
  0x54   :  { %v209_v24 = vadd.f32 %v201_v17, %v187_v6  ;;  %v210_v25 = vadd.f32 %v202_v18, %v188_v7  ;;  %v215_v28 = vmul.f32 %v212_v14, %v1509_v2  ;;  %v216_v29 = vmul.f32 %v212_v14, %v1511_v3 }
  0x55   :  { %v173_v30 = vmax.f32 %v1551_v12, 0.0  ;;  %v174_v31 = vmax.f32 %v1553_v13, 0.0  ;;  %v234_v32 = vstv %s1539_s2  ;;  %v256_v33 = vstv %s1541_s6  ;;  %s1790_s2 = sld [smem:[#allocation8 + $0x205]] }
  0x56   :  { %v221_v34 = vrot.slane %v213_v26, 2  ;;  %v222_v35 = vrot.slane %v214_v27, 2  ;;  %v223_v36 = vrot.slane %v215_v28, 2  ;;  %v224_v37 = vrot.slane %v216_v29, 2  ;;  %s1813_s6 = sld [smem:[#allocation9 + $0x5]] }
  0x57   :  { %v235_v38 = vmul.f32 %v234_v32, %v1505_v0  ;;  %v236_v39 = vmul.f32 %v234_v32, %v1507_v1  ;;  %v237_v40 = vmul.f32 %v234_v32, %v1509_v2  ;;  %v238_v41 = vmul.f32 %v234_v32, %v1511_v3 }
  0x58   :  { %v229_v42 = vadd.f32 %v221_v34, %v207_v22  ;;  %v230_v43 = vadd.f32 %v222_v35, %v208_v23  ;;  %v231_v44 = vadd.f32 %v223_v36, %v209_v24  ;;  %v232_v45 = vadd.f32 %v224_v37, %v210_v25 }
  0x59   :  { %v243_v46 = vrot.slane %v235_v38, 3  ;;  %v244_v47 = vrot.slane %v236_v39, 3  ;;  %v245_v48 = vrot.slane %v237_v40, 3  ;;  %v246_v49 = vrot.slane %v238_v41, 3 }
  0x5a   :  { %v257_v50 = vmul.f32 %v256_v33, %v1505_v0  ;;  %v258_v51 = vmul.f32 %v256_v33, %v1507_v1  ;;  %v259_v52 = vmul.f32 %v256_v33, %v1509_v2  ;;  %v260_v53 = vmul.f32 %v256_v33, %v1511_v3 }
  0x5b   :  { %v251_v54 = vadd.f32 %v243_v46, %v229_v42  ;;  %v252_v55 = vadd.f32 %v244_v47, %v230_v43  ;;  %v253_v56 = vadd.f32 %v245_v48, %v231_v44  ;;  %v254_v57 = vadd.f32 %v246_v49, %v232_v45 }
  0x5c   :  { %v265_v58 = vrot.slane %v257_v50, 4  ;;  %v266_v59 = vrot.slane %v258_v51, 4  ;;  %v267_v60 = vrot.slane %v259_v52, 4  ;;  %v268_v61 = vrot.slane %v260_v53, 4 }
  0x5d   :  { %v175_v62 = vmax.f32 %v1555_v19, 0.0  ;;  %v278_v63 = vstv %s1565_s7  ;;  %v298_v4 = vstv %s1571_s8  ;;  %v304_v5 = vstv %s1573_s9  ;;  %s1821_s7 = sld [smem:[#allocation8 + $0x6]]  ;;  %s1829_s9 = sld [smem:[#allocation10 + $0x5]] }
  0x5e   :  { %v273_v6 = vadd.f32 %v265_v58, %v251_v54  ;;  %v274_v7 = vadd.f32 %v266_v59, %v252_v55  ;;  %v275_v8 = vadd.f32 %v267_v60, %v253_v56  ;;  %v276_v9 = vadd.f32 %v268_v61, %v254_v57  ;;  %s1823_s8 = sld [smem:[#allocation8 + $0x86]] }
  0x5f   :  { %v176_v10 = vmax.f32 %v1557_v20, 0.0  ;;  %v1595_v11 = vstv %s1579_s10  ;;  %v299_v14 = vmul.f32 %v298_v4, %v1505_v0  ;;  %v300_v15 = vmul.f32 %v298_v4, %v1507_v1  ;;  %s1835_s10 = sld [smem:[#allocation8 + $0x106]] }
  0x60   :  { %v279_v16 = vadd.f32 %v278_v63, %v273_v6  ;;  %v280_v17 = vadd.f32 %v278_v63, %v274_v7  ;;  %v1599_v18 = vadd.f32 %v278_v63, %v275_v8  ;;  %v1601_v22 = vadd.f32 %v278_v63, %v276_v9 }
  0x61   :  { %v305_v23 = vmul.f32 %v304_v5, %v1505_v0  ;;  %v306_v24 = vmul.f32 %v304_v5, %v1507_v1  ;;  %v307_v20 = vmul.f32 %v304_v5, %v1509_v2  ;;  %v308_v25 = vmul.f32 %v304_v5, %v1511_v3 }
  0x62   :  { %v283_v26 = vmax.f32 %v279_v16, 0.0  ;;  %v284_v27 = vmax.f32 %v280_v17, 0.0  ;;  %v301_v28 = vmul.f32 %v298_v4, %v1509_v2  ;;  %v302_v29 = vmul.f32 %v298_v4, %v1511_v3 }
  0x63   :  { %v313_v32 = vrot.slane %v305_v23, 1  ;;  %v314_v33 = vrot.slane %v306_v24, 1  ;;  %v315_v34 = vrot.slane %v307_v20, 1  ;;  %v316_v35 = vrot.slane %v308_v25, 1 }
  0x64   :  { %v179_v36 = vmul.f32 %v1559_v21, %v173_v30  ;;  %v180_v37 = vmul.f32 %v1559_v21, %v174_v31  ;;  %v326_v38 = vstv %s1585_s11  ;;  %v348_v39 = vstv %s1587_s12  ;;  %s1837_s11 = sld [smem:[#allocation8 + $0x186]] }
  0x65   :  { %v285_v40 = vmax.f32 %v1599_v18, 0.0  ;;  %v286_v41 = vmax.f32 %v1601_v22, 0.0  ;;  %v289_v42 = vmul.f32 %v1595_v11, %v283_v26  ;;  %v290_v12 = vmul.f32 %v1595_v11, %v284_v27  ;;  %s1865_s12 = sld [smem:[#allocation8 + $0x206]] }
  0x66   :  { %v321_v43 = vadd.f32 %v313_v32, %v299_v14  ;;  %v322_v30 = vadd.f32 %v314_v33, %v300_v15  ;;  %v323_v44 = vadd.f32 %v315_v34, %v301_v28  ;;  %v324_v13 = vadd.f32 %v316_v35, %v302_v29 }
  0x67   :  { %v327_v31 = vmul.f32 %v326_v38, %v1505_v0  ;;  %v328_v45 = vmul.f32 %v326_v38, %v1507_v1  ;;  %v329_v46 = vmul.f32 %v326_v38, %v1509_v2  ;;  %v330_v47 = vmul.f32 %v326_v38, %v1511_v3 }
  0x68   :  { %v349_v48 = vmul.f32 %v348_v39, %v1505_v0  ;;  %v350_v49 = vmul.f32 %v348_v39, %v1507_v1  ;;  %v351_v50 = vmul.f32 %v348_v39, %v1509_v2  ;;  %v352_v51 = vmul.f32 %v348_v39, %v1511_v3 }
  0x69   :  { %v335_v52 = vrot.slane %v327_v31, 2  ;;  %v336_v53 = vrot.slane %v328_v45, 2  ;;  %v337_v54 = vrot.slane %v329_v46, 2  ;;  %v338_v55 = vrot.slane %v330_v47, 2 }
  0x6a   :  { %v357_v56 = vrot.slane %v349_v48, 3  ;;  %v358_v57 = vrot.slane %v350_v49, 3  ;;  %v359_v58 = vrot.slane %v351_v50, 3  ;;  %v360_v59 = vrot.slane %v352_v51, 3 }
  0x6b   :  { %v343_v60 = vadd.f32 %v335_v52, %v321_v43  ;;  %v344_v61 = vadd.f32 %v336_v53, %v322_v30  ;;  %v345_v63 = vadd.f32 %v337_v54, %v323_v44  ;;  %v346_v4 = vadd.f32 %v338_v55, %v324_v13 }
  0x6c   :  { %v181_v5 = vmul.f32 %v1559_v21, %v175_v62  ;;  %v1641_v6 = vmul.f32 %v1559_v21, %v176_v10  ;;  %v370_v7 = vstv %s1617_s13  ;;  %v412_v8 = vstv %s1619_s14  ;;  %s1867_s13 = sld [smem:[#allocation8 + $0x7]]  ;;  %s1881_s14 = sld [smem:[#allocation9 + $0x6]] }
  0x6d   :  { %v365_v9 = vadd.f32 %v357_v56, %v343_v60  ;;  %v366_v14 = vadd.f32 %v358_v57, %v344_v61  ;;  %v367_v15 = vadd.f32 %v359_v58, %v345_v63  ;;  %v368_v16 = vadd.f32 %v360_v59, %v346_v4 }
  0x6e   :  { %v371_v17 = vmul.f32 %v370_v7, %v1505_v0  ;;  %v372_v18 = vmul.f32 %v370_v7, %v1507_v1  ;;  %v373_v19 = vmul.f32 %v370_v7, %v1509_v2  ;;  %v374_v62 = vmul.f32 %v370_v7, %v1511_v3 }
  0x6f   :  { %v291_v21 = vmul.f32 %v1595_v11, %v285_v40  ;;  %v1655_v10 = vmul.f32 %v1595_v11, %v286_v41  ;;  %v1657_v22 = vadd.f32 %v289_v42, %v179_v36  ;;  %v1659_v23 = vadd.f32 %v290_v12, %v180_v37 }
  0x70   :  { %v379_v24 = vrot.slane %v371_v17, 4  ;;  %v380_v20 = vrot.slane %v372_v18, 4  ;;  %v381_v25 = vrot.slane %v373_v19, 4  ;;  %v382_v26 = vrot.slane %v374_v62, 4 }
  0x71   :  { %v392_v27 = vstv %s1633_s15  ;;  %v413_v28 = vmul.f32 %v412_v8, %v1505_v0  ;;  %v414_v29 = vmul.f32 %v412_v8, %v1507_v1  ;;  %v418_v11 = vstv %s1635_s16  ;;  %s1883_s15 = sld [smem:[#allocation8 + $0x87]] }
  0x72   :  { %v387_v32 = vadd.f32 %v379_v24, %v365_v9  ;;  %v388_v33 = vadd.f32 %v380_v20, %v366_v14  ;;  %v389_v34 = vadd.f32 %v381_v25, %v367_v15  ;;  %v390_v35 = vadd.f32 %v382_v26, %v368_v16  ;;  %s1892_s16 = sld [smem:[#allocation8 + $0x107]] }
  0x73   :  { %v419_v36 = vmul.f32 %v418_v11, %v1505_v0  ;;  %v420_v37 = vmul.f32 %v418_v11, %v1507_v1  ;;  %v421_v38 = vmul.f32 %v418_v11, %v1509_v2  ;;  %v422_v39 = vmul.f32 %v418_v11, %v1511_v3 }
  0x74   :  { %v393_v40 = vadd.f32 %v392_v27, %v387_v32  ;;  %v415_v41 = vmul.f32 %v412_v8, %v1509_v2  ;;  %v416_v42 = vmul.f32 %v412_v8, %v1511_v3  ;;  %v440_v12 = vstv %s1645_s0  ;;  %s1906_s0 = sld [smem:[#allocation10 + $0x6]] }
  0x75   :  { %v427_v43 = vrot.slane %v419_v36, 1  ;;  %v428_v30 = vrot.slane %v420_v37, 1  ;;  %v429_v44 = vrot.slane %v421_v38, 1  ;;  %v430_v13 = vrot.slane %v422_v39, 1 }
  0x76   :  { %v394_v31 = vadd.f32 %v392_v27, %v388_v33  ;;  %v395_v45 = vadd.f32 %v392_v27, %v389_v34  ;;  %v1676_v46 = vadd.f32 %v392_v27, %v390_v35  ;;  %v397_v47 = vmax.f32 %v393_v40, 0.0 }
  0x77   :  { %v1678_v48 = vadd.f32 %v291_v21, %v181_v5  ;;  %v1681_v49 = vstv %s1651_s17  ;;  %v462_v50 = vstv %s1661_s18  ;;  %v484_v51 = vstv %s1663_s19  ;;  %s1916_s17 = sld [smem:[#allocation8 + $0x187]] }
  0x78   :  { %v435_v52 = vadd.f32 %v427_v43, %v413_v28  ;;  %v436_v53 = vadd.f32 %v428_v30, %v414_v29  ;;  %v437_v54 = vadd.f32 %v429_v44, %v415_v41  ;;  %v438_v55 = vadd.f32 %v430_v13, %v416_v42  ;;  %s1918_s18 = sld [smem:[#allocation8 + $0x207]] }
  0x79   :  { %v441_v56 = vmul.f32 %v440_v12, %v1505_v0  ;;  %v442_v57 = vmul.f32 %v440_v12, %v1507_v1  ;;  %v443_v58 = vmul.f32 %v440_v12, %v1509_v2  ;;  %v444_v59 = vmul.f32 %v440_v12, %v1511_v3  ;;  %s1944_s19 = sld [smem:[#allocation9 + $0x7]] }
  0x7a   :  { %v398_v60 = vmax.f32 %v394_v31, 0.0  ;;  %v399_v61 = vmax.f32 %v395_v45, 0.0  ;;  %v400_v63 = vmax.f32 %v1676_v46, 0.0  ;;  %v1695_v4 = vmul.f32 %v1681_v49, %v397_v47 }
  0x7b   :  { %v449_v5 = vrot.slane %v441_v56, 2  ;;  %v450_v7 = vrot.slane %v442_v57, 2  ;;  %v451_v8 = vrot.slane %v443_v58, 2  ;;  %v452_v9 = vrot.slane %v444_v59, 2 }
  0x7c   :  { %v463_v14 = vmul.f32 %v462_v50, %v1505_v0  ;;  %v464_v15 = vmul.f32 %v462_v50, %v1507_v1  ;;  %v465_v16 = vmul.f32 %v462_v50, %v1509_v2  ;;  %v466_v17 = vmul.f32 %v462_v50, %v1511_v3 }
  0x7d   :  { %v457_v18 = vadd.f32 %v449_v5, %v435_v52  ;;  %v458_v19 = vadd.f32 %v450_v7, %v436_v53  ;;  %v459_v62 = vadd.f32 %v451_v8, %v437_v54  ;;  %v460_v21 = vadd.f32 %v452_v9, %v438_v55 }
  0x7e   :  { %v471_v24 = vrot.slane %v463_v14, 3  ;;  %v472_v20 = vrot.slane %v464_v15, 3  ;;  %v473_v25 = vrot.slane %v465_v16, 3  ;;  %v474_v26 = vrot.slane %v466_v17, 3 }
  0x7f   :  { %v485_v27 = vmul.f32 %v484_v51, %v1505_v0  ;;  %v486_v28 = vmul.f32 %v484_v51, %v1507_v1  ;;  %v487_v29 = vmul.f32 %v484_v51, %v1509_v2  ;;  %v488_v11 = vmul.f32 %v484_v51, %v1511_v3 }
  0x80   :  { %v479_v32 = vadd.f32 %v471_v24, %v457_v18  ;;  %v480_v33 = vadd.f32 %v472_v20, %v458_v19  ;;  %v481_v34 = vadd.f32 %v473_v25, %v459_v62  ;;  %v482_v35 = vadd.f32 %v474_v26, %v460_v21 }
  0x81   :  { %v493_v36 = vrot.slane %v485_v27, 4  ;;  %v494_v37 = vrot.slane %v486_v28, 4  ;;  %v495_v38 = vrot.slane %v487_v29, 4  ;;  %v496_v39 = vrot.slane %v488_v11, 4 }
  0x82   :  { %v404_v40 = vmul.f32 %v1681_v49, %v398_v60  ;;  %v506_v41 = vstv %s1689_s20  ;;  %v526_v42 = vstv %s1691_s21  ;;  %v532_v12 = vstv %s1697_s1  ;;  %s1946_s20 = sld [smem:[#allocation8 + $0x8]]  ;;  %s1958_s1 = sld [smem:[#allocation10 + $0x7]] }
  0x83   :  { %v501_v43 = vadd.f32 %v493_v36, %v479_v32  ;;  %v502_v30 = vadd.f32 %v494_v37, %v480_v33  ;;  %v503_v44 = vadd.f32 %v495_v38, %v481_v34  ;;  %v504_v13 = vadd.f32 %v496_v39, %v482_v35  ;;  %s1952_s21 = sld [smem:[#allocation8 + $0x88]] }
  0x84   :  { %v405_v31 = vmul.f32 %v1681_v49, %v399_v61  ;;  %v1717_v45 = vstv %s1703_s3  ;;  %v527_v47 = vmul.f32 %v526_v42, %v1505_v0  ;;  %v528_v50 = vmul.f32 %v526_v42, %v1507_v1  ;;  %s1968_s3 = sld [smem:[#allocation8 + $0x108]] }
  0x85   :  { %v507_v51 = vadd.f32 %v506_v41, %v501_v43  ;;  %v508_v52 = vadd.f32 %v506_v41, %v502_v30  ;;  %v1725_v53 = vadd.f32 %v506_v41, %v503_v44  ;;  %v1727_v54 = vadd.f32 %v506_v41, %v504_v13 }
  0x86   :  { %v533_v55 = vmul.f32 %v532_v12, %v1505_v0  ;;  %v534_v56 = vmul.f32 %v532_v12, %v1507_v1  ;;  %v535_v57 = vmul.f32 %v532_v12, %v1509_v2  ;;  %v536_v58 = vmul.f32 %v532_v12, %v1511_v3 }
  0x87   :  { %v511_v59 = vmax.f32 %v507_v51, 0.0  ;;  %v512_v60 = vmax.f32 %v508_v52, 0.0  ;;  %v529_v61 = vmul.f32 %v526_v42, %v1509_v2  ;;  %v530_v5 = vmul.f32 %v526_v42, %v1511_v3 }
  0x88   :  { %v541_v7 = vrot.slane %v533_v55, 1  ;;  %v542_v8 = vrot.slane %v534_v56, 1  ;;  %v543_v9 = vrot.slane %v535_v57, 1  ;;  %v544_v14 = vrot.slane %v536_v58, 1 }
  0x89   :  { %v296_v15 = vadd.f32 %v1655_v10, %v1641_v6  ;;  %v406_v16 = vmul.f32 %v1681_v49, %v400_v63  ;;  %v407_v17 = vadd.f32 %v1695_v4, %v1657_v22  ;;  %v408_v18 = vadd.f32 %v404_v40, %v1659_v23 }
  0x8a   :  { %v1744_v19 = vadd.f32 %v405_v31, %v1678_v48  ;;  %v513_v62 = vmax.f32 %v1725_v53, 0.0  ;;  %v514_v21 = vmax.f32 %v1727_v54, 0.0  ;;  %v517_v24 = vmul.f32 %v1717_v45, %v511_v59 }
  0x8b   :  { %v518_v6 = vmul.f32 %v1717_v45, %v512_v60  ;;  %v549_v10 = vadd.f32 %v541_v7, %v527_v47  ;;  %v550_v46 = vadd.f32 %v542_v8, %v528_v50  ;;  %v551_v20 = vadd.f32 %v543_v9, %v529_v61 }
  0x8c   :  { %v552_v49 = vadd.f32 %v544_v14, %v530_v5  ;;  %v554_v63 = vstv %s1713_s22  ;;  %v576_v25 = vstv %s1721_s23  ;;  %v598_v22 = vstv %s1723_s24  ;;  %s1976_s22 = sld [smem:[#allocation8 + $0x188]] }
  0x8d   :  { %v555_v23 = vmul.f32 %v554_v63, %v1505_v0  ;;  %v556_v48 = vmul.f32 %v554_v63, %v1507_v1  ;;  %v557_v4 = vmul.f32 %v554_v63, %v1509_v2  ;;  %v558_v26 = vmul.f32 %v554_v63, %v1511_v3  ;;  %s1978_s23 = sld [smem:[#allocation8 + $0x208]] }
  0x8e   :  { %v577_v27 = vmul.f32 %v576_v25, %v1505_v0  ;;  %v578_v28 = vmul.f32 %v576_v25, %v1507_v1  ;;  %v579_v29 = vmul.f32 %v576_v25, %v1509_v2  ;;  %v580_v11 = vmul.f32 %v576_v25, %v1511_v3  ;;  %s2012_s24 = sld [smem:[#allocation9 + $0x8]] }
  0x8f   :  { %v563_v32 = vrot.slane %v555_v23, 2  ;;  %v564_v33 = vrot.slane %v556_v48, 2  ;;  %v565_v34 = vrot.slane %v557_v4, 2  ;;  %v566_v35 = vrot.slane %v558_v26, 2 }
  0x90   :  { %v585_v36 = vrot.slane %v577_v27, 3  ;;  %v586_v37 = vrot.slane %v578_v28, 3  ;;  %v587_v38 = vrot.slane %v579_v29, 3  ;;  %v588_v39 = vrot.slane %v580_v11, 3 }
  0x91   :  { %v571_v40 = vadd.f32 %v563_v32, %v549_v10  ;;  %v572_v41 = vadd.f32 %v564_v33, %v550_v46  ;;  %v573_v42 = vadd.f32 %v565_v34, %v551_v20  ;;  %v574_v12 = vadd.f32 %v566_v35, %v552_v49 }
  0x92   :  { %v599_v43 = vmul.f32 %v598_v22, %v1505_v0  ;;  %v600_v30 = vmul.f32 %v598_v22, %v1507_v1  ;;  %v601_v44 = vmul.f32 %v598_v22, %v1509_v2  ;;  %v602_v13 = vmul.f32 %v598_v22, %v1511_v3 }
  0x93   :  { %v593_v31 = vadd.f32 %v585_v36, %v571_v40  ;;  %v594_v47 = vadd.f32 %v586_v37, %v572_v41  ;;  %v595_v50 = vadd.f32 %v587_v38, %v573_v42  ;;  %v596_v51 = vadd.f32 %v588_v39, %v574_v12 }
  0x94   :  { %v607_v52 = vrot.slane %v599_v43, 4  ;;  %v608_v53 = vrot.slane %v600_v30, 4  ;;  %v609_v54 = vrot.slane %v601_v44, 4  ;;  %v610_v55 = vrot.slane %v602_v13, 4 }
  0x95   :  { %v410_v56 = vadd.f32 %v406_v16, %v296_v15  ;;  %v519_v57 = vmul.f32 %v1717_v45, %v513_v62  ;;  %v620_v58 = vstv %s1757_s25  ;;  %v646_v59 = vstv %s1759_s26  ;;  %s2014_s25 = sld [smem:[#allocation8 + $0x89]] }
  0x96   :  { %v615_v60 = vadd.f32 %v607_v52, %v593_v31  ;;  %v616_v61 = vadd.f32 %v608_v53, %v594_v47  ;;  %v617_v5 = vadd.f32 %v609_v54, %v595_v50  ;;  %v618_v7 = vadd.f32 %v610_v55, %v596_v51  ;;  %s2020_s26 = sld [smem:[#allocation8 + $0x9]] }
  0x97   :  { %v520_v8 = vmul.f32 %v1717_v45, %v514_v21  ;;  %v1779_v9 = vadd.f32 %v517_v24, %v407_v17  ;;  %v1781_v14 = vadd.f32 %v518_v6, %v408_v18  ;;  %v640_v10 = vstv %s1765_s27  ;;  %s2026_s27 = sld [smem:[#allocation8 + $0x109]] }
  0x98   :  { %v621_v46 = vadd.f32 %v620_v58, %v615_v60  ;;  %v622_v20 = vadd.f32 %v620_v58, %v616_v61  ;;  %v1784_v15 = vadd.f32 %v620_v58, %v617_v5  ;;  %v1786_v16 = vadd.f32 %v620_v58, %v618_v7 }
  0x99   :  { %v647_v62 = vmul.f32 %v646_v59, %v1505_v0  ;;  %v648_v45 = vmul.f32 %v646_v59, %v1507_v1  ;;  %v649_v17 = vmul.f32 %v646_v59, %v1509_v2  ;;  %v650_v18 = vmul.f32 %v646_v59, %v1511_v3 }
  0x9a   :  { %v641_v21 = vmul.f32 %v640_v10, %v1505_v0  ;;  %v642_v24 = vmul.f32 %v640_v10, %v1507_v1  ;;  %v643_v6 = vmul.f32 %v640_v10, %v1509_v2  ;;  %v644_v49 = vmul.f32 %v640_v10, %v1511_v3 }
  0x9b   :  { %v655_v63 = vrot.slane %v647_v62, 1  ;;  %v656_v25 = vrot.slane %v648_v45, 1  ;;  %v657_v22 = vrot.slane %v649_v17, 1  ;;  %v658_v23 = vrot.slane %v650_v18, 1 }
  0x9c   :  { %v1801_v48 = vadd.f32 %v519_v57, %v1744_v19  ;;  %v625_v4 = vmax.f32 %v621_v46, 0.0  ;;  %v626_v26 = vmax.f32 %v622_v20, 0.0  ;;  %v668_v27 = vstv %s1771_s28  ;;  %s2030_s28 = sld [smem:[#allocation10 + $0x8]] }
  0x9d   :  { %v1804_v28 = vadd.f32 %v520_v8, %v410_v56  ;;  %v627_v29 = vmax.f32 %v1784_v15, 0.0  ;;  %v628_v11 = vmax.f32 %v1786_v16, 0.0  ;;  %v630_v32 = vstv %s1775_s29  ;;  %s2043_s29 = sld [smem:[#allocation8 + $0x189]] }
  0x9e   :  { %v663_v33 = vadd.f32 %v655_v63, %v641_v21  ;;  %v664_v34 = vadd.f32 %v656_v25, %v642_v24  ;;  %v665_v35 = vadd.f32 %v657_v22, %v643_v6  ;;  %v666_v36 = vadd.f32 %v658_v23, %v644_v49 }
  0x9f   :  { %v669_v37 = vmul.f32 %v668_v27, %v1505_v0  ;;  %v670_v19 = vmul.f32 %v668_v27, %v1507_v1  ;;  %v671_v38 = vmul.f32 %v668_v27, %v1509_v2  ;;  %v672_v39 = vmul.f32 %v668_v27, %v1511_v3 }
  0xa0   :  { %v1815_v40 = vmul.f32 %v630_v32, %v625_v4  ;;  %v1817_v41 = vmul.f32 %v630_v32, %v626_v26  ;;  %v690_v42 = vstv %s1788_s30  ;;  %v712_v12 = vstv %s1790_s2  ;;  %s2045_s30 = sld [smem:[#allocation8 + $0x209]] }
  0xa1   :  { %v677_v43 = vrot.slane %v669_v37, 2  ;;  %v678_v30 = vrot.slane %v670_v19, 2  ;;  %v679_v44 = vrot.slane %v671_v38, 2  ;;  %v680_v13 = vrot.slane %v672_v39, 2  ;;  %s2070_s2 = sld [smem:[#allocation9 + $0x9]] }
  0xa2   :  { %v691_v31 = vmul.f32 %v690_v42, %v1505_v0  ;;  %v692_v47 = vmul.f32 %v690_v42, %v1507_v1  ;;  %v693_v50 = vmul.f32 %v690_v42, %v1509_v2  ;;  %v694_v51 = vmul.f32 %v690_v42, %v1511_v3 }
  0xa3   :  { %v685_v52 = vadd.f32 %v677_v43, %v663_v33  ;;  %v686_v53 = vadd.f32 %v678_v30, %v664_v34  ;;  %v687_v54 = vadd.f32 %v679_v44, %v665_v35  ;;  %v688_v55 = vadd.f32 %v680_v13, %v666_v36 }
  0xa4   :  { %v699_v56 = vrot.slane %v691_v31, 3  ;;  %v700_v57 = vrot.slane %v692_v47, 3  ;;  %v701_v58 = vrot.slane %v693_v50, 3  ;;  %v702_v59 = vrot.slane %v694_v51, 3 }
  0xa5   :  { %v713_v60 = vmul.f32 %v712_v12, %v1505_v0  ;;  %v714_v61 = vmul.f32 %v712_v12, %v1507_v1  ;;  %v715_v5 = vmul.f32 %v712_v12, %v1509_v2  ;;  %v716_v7 = vmul.f32 %v712_v12, %v1511_v3 }
  0xa6   :  { %v707_v8 = vadd.f32 %v699_v56, %v685_v52  ;;  %v708_v10 = vadd.f32 %v700_v57, %v686_v53  ;;  %v709_v46 = vadd.f32 %v701_v58, %v687_v54  ;;  %v710_v20 = vadd.f32 %v702_v59, %v688_v55 }
  0xa7   :  { %v721_v15 = vrot.slane %v713_v60, 4  ;;  %v722_v16 = vrot.slane %v714_v61, 4  ;;  %v723_v62 = vrot.slane %v715_v5, 4  ;;  %v724_v45 = vrot.slane %v716_v7, 4 }
  0xa8   :  { %v1839_v17 = vmul.f32 %v630_v32, %v627_v29  ;;  %v734_v18 = vstv %s1813_s6  ;;  %v754_v21 = vstv %s1821_s7  ;;  %v760_v24 = vstv %s1823_s8  ;;  %s2076_s6 = sld [smem:[#allocation10 + $0x9]] }
  0xa9   :  { %v729_v6 = vadd.f32 %v721_v15, %v707_v8  ;;  %v730_v49 = vadd.f32 %v722_v16, %v708_v10  ;;  %v731_v63 = vadd.f32 %v723_v62, %v709_v46  ;;  %v732_v25 = vadd.f32 %v724_v45, %v710_v20 }
  0xaa   :  { %v634_v22 = vmul.f32 %v630_v32, %v628_v11  ;;  %v1845_v23 = vstv %s1829_s9  ;;  %v755_v4 = vmul.f32 %v754_v21, %v1505_v0  ;;  %v756_v26 = vmul.f32 %v754_v21, %v1507_v1  ;;  %s1437_s9 = smov [#allocation12]  }
  0xab   :  { %v735_v27 = vadd.f32 %v734_v18, %v729_v6  ;;  %v736_v33 = vadd.f32 %v734_v18, %v730_v49  ;;  %v1849_v34 = vadd.f32 %v734_v18, %v731_v63  ;;  %v1851_v29 = vadd.f32 %v734_v18, %v732_v25  ;;  %v1894_v25 = vld [vmem:[#allocation3] sm:$0x1f] }
  0xac   :  { %v761_v35 = vmul.f32 %v760_v24, %v1505_v0  ;;  %v762_v36 = vmul.f32 %v760_v24, %v1507_v1  ;;  %v763_v11 = vmul.f32 %v760_v24, %v1509_v2  ;;  %v764_v32 = vmul.f32 %v760_v24, %v1511_v3 }
  0xad   :  { %v739_v37 = vmax.f32 %v735_v27, 0.0  ;;  %v740_v19 = vmax.f32 %v736_v33, 0.0  ;;  %v757_v38 = vmul.f32 %v754_v21, %v1509_v2  ;;  %v758_v39 = vmul.f32 %v754_v21, %v1511_v3 }
  0xae   :  { %v769_v42 = vrot.slane %v761_v35, 1  ;;  %v770_v12 = vrot.slane %v762_v36, 1  ;;  %v771_v43 = vrot.slane %v763_v11, 1  ;;  %v772_v30 = vrot.slane %v764_v32, 1 }
  0xaf   :  { %v635_v44 = vadd.f32 %v1815_v40, %v1779_v9  ;;  %v636_v13 = vadd.f32 %v1817_v41, %v1781_v14  ;;  %v782_v31 = vstv %s1835_s10  ;;  %v804_v47 = vstv %s1837_s11  ;;  %s1255_s10 = sshll.u32 %s1437_s9, 4  ;;  %s1256_s10 = int_to_ptr.vmem [resolvable:$true] %s1255_s10 }
  0xb0   :  { %v741_v50 = vmax.f32 %v1849_v34, 0.0  ;;  %v742_v51 = vmax.f32 %v1851_v29, 0.0  ;;  %v745_v52 = vmul.f32 %v1845_v23, %v739_v37  ;;  %v746_v53 = vmul.f32 %v1845_v23, %v740_v19  ;;  %p1405_p8 = scmp.lt.s32.totalorder %s1256_s10, %s1256_s10 }
  0xb1   :  { %v777_v54 = vadd.f32 %v769_v42, %v755_v4  ;;  %v778_v55 = vadd.f32 %v770_v12, %v756_v26  ;;  %v779_v9 = vadd.f32 %v771_v43, %v757_v38  ;;  %v780_v40 = vadd.f32 %v772_v30, %v758_v39  ;;  %v1897_v26 = vld [vmem:[#allocation3 + $0x8] sm:$0x1f] }
  0xb2   :  { %v783_v14 = vmul.f32 %v782_v31, %v1505_v0  ;;  %v784_v41 = vmul.f32 %v782_v31, %v1507_v1  ;;  %v785_v56 = vmul.f32 %v782_v31, %v1509_v2  ;;  %v786_v57 = vmul.f32 %v782_v31, %v1511_v3 }
  0xb3   :  { %v805_v58 = vmul.f32 %v804_v47, %v1505_v0  ;;  %v806_v59 = vmul.f32 %v804_v47, %v1507_v1  ;;  %v807_v60 = vmul.f32 %v804_v47, %v1509_v2  ;;  %v808_v61 = vmul.f32 %v804_v47, %v1511_v3 }
  0xb4   :  { %v791_v5 = vrot.slane %v783_v14, 2  ;;  %v792_v7 = vrot.slane %v784_v41, 2  ;;  %v793_v8 = vrot.slane %v785_v56, 2  ;;  %v794_v10 = vrot.slane %v786_v57, 2 }
  0xb5   :  { %v813_v46 = vrot.slane %v805_v58, 3  ;;  %v814_v20 = vrot.slane %v806_v59, 3  ;;  %v815_v15 = vrot.slane %v807_v60, 3  ;;  %v816_v0 = vrot.slane %v808_v61, 3 }
  0xb6   :  { %v799_v16 = vadd.f32 %v791_v5, %v777_v54  ;;  %v800_v1 = vadd.f32 %v792_v7, %v778_v55  ;;  %v801_v62 = vadd.f32 %v793_v8, %v779_v9  ;;  %v802_v2 = vadd.f32 %v794_v10, %v780_v40 }
  0xb7   :  { %v637_v3 = vadd.f32 %v1839_v17, %v1801_v48  ;;  %v1888_v45 = vadd.f32 %v634_v22, %v1804_v28  ;;  %v826_v18 = vstv %s1865_s12  ;;  %v868_v21 = vstv %s1867_s13  ;;  %v1900_v48 = vld [vmem:[#allocation3 + $0x10] sm:$0x1f]  ;;  %v1903_v17 = vld [vmem:[#allocation3 + $0x18] sm:$0x1f] }
  0xb8   :  { %v821_v24 = vadd.f32 %v813_v46, %v799_v16  ;;  %v822_v6 = vadd.f32 %v814_v20, %v800_v1  ;;  %v823_v49 = vadd.f32 %v815_v15, %v801_v62  ;;  %v824_v63 = vadd.f32 %v816_v0, %v802_v2 }
  0xb9   :  { %v827_v4 = vmul.f32 %v1894_v25, %v826_v18  ;;  %v828_v27 = vmul.f32 %v1897_v26, %v826_v18  ;;  %v829_v28 = vmul.f32 %v1900_v48, %v826_v18  ;;  %v830_v22 = vmul.f32 %v1903_v17, %v826_v18 }
  0xba   :  { %v747_v33 = vmul.f32 %v1845_v23, %v741_v50  ;;  %v1910_v34 = vmul.f32 %v1845_v23, %v742_v51  ;;  %v1912_v29 = vadd.f32 %v745_v52, %v635_v44  ;;  %v1914_v35 = vadd.f32 %v746_v53, %v636_v13 }
  0xbb   :  { %v835_v36 = vrot.slane %v827_v4, 4  ;;  %v836_v11 = vrot.slane %v828_v27, 4  ;;  %v837_v32 = vrot.slane %v829_v28, 4  ;;  %v838_v37 = vrot.slane %v830_v22, 4 }
  0xbc   :  { %v848_v19 = vstv %s1881_s14  ;;  %v869_v38 = vmul.f32 %v1894_v25, %v868_v21  ;;  %v870_v39 = vmul.f32 %v1897_v26, %v868_v21  ;;  %v874_v23 = vstv %s1883_s15 }
  0xbd   :  { %v843_v42 = vadd.f32 %v835_v36, %v821_v24  ;;  %v844_v12 = vadd.f32 %v836_v11, %v822_v6  ;;  %v845_v43 = vadd.f32 %v837_v32, %v823_v49  ;;  %v846_v30 = vadd.f32 %v838_v37, %v824_v63 }
  0xbe   :  { %v875_v44 = vmul.f32 %v1894_v25, %v874_v23  ;;  %v876_v13 = vmul.f32 %v1897_v26, %v874_v23  ;;  %v877_v31 = vmul.f32 %v1900_v48, %v874_v23  ;;  %v878_v47 = vmul.f32 %v1903_v17, %v874_v23 }
  0xbf   :  { %v849_v50 = vadd.f32 %v848_v19, %v843_v42  ;;  %v871_v51 = vmul.f32 %v1900_v48, %v868_v21  ;;  %v872_v52 = vmul.f32 %v1903_v17, %v868_v21  ;;  %v896_v53 = vstv %s1892_s16 }
  0xc0   :  { %v883_v54 = vrot.slane %v875_v44, 1  ;;  %v884_v55 = vrot.slane %v876_v13, 1  ;;  %v885_v9 = vrot.slane %v877_v31, 1  ;;  %v886_v40 = vrot.slane %v878_v47, 1 }
  0xc1   :  { %v850_v14 = vadd.f32 %v848_v19, %v844_v12  ;;  %v851_v41 = vadd.f32 %v848_v19, %v845_v43  ;;  %v1931_v56 = vadd.f32 %v848_v19, %v846_v30  ;;  %v853_v57 = vmax.f32 %v849_v50, 0.0 }
  0xc2   :  { %v1933_v58 = vadd.f32 %v747_v33, %v637_v3  ;;  %v1936_v59 = vstv %s1906_s0  ;;  %v918_v60 = vstv %s1916_s17  ;;  %v940_v61 = vstv %s1918_s18 }
  0xc3   :  { %v891_v5 = vadd.f32 %v883_v54, %v869_v38  ;;  %v892_v7 = vadd.f32 %v884_v55, %v870_v39  ;;  %v893_v8 = vadd.f32 %v885_v9, %v871_v51  ;;  %v894_v10 = vadd.f32 %v886_v40, %v872_v52 }
  0xc4   :  { %v897_v46 = vmul.f32 %v1894_v25, %v896_v53  ;;  %v898_v20 = vmul.f32 %v1897_v26, %v896_v53  ;;  %v899_v15 = vmul.f32 %v1900_v48, %v896_v53  ;;  %v900_v0 = vmul.f32 %v1903_v17, %v896_v53 }
  0xc5   :  { %v854_v16 = vmax.f32 %v850_v14, 0.0  ;;  %v855_v1 = vmax.f32 %v851_v41, 0.0  ;;  %v856_v62 = vmax.f32 %v1931_v56, 0.0  ;;  %v1950_v2 = vmul.f32 %v1936_v59, %v853_v57 }
  0xc6   :  { %v905_v3 = vrot.slane %v897_v46, 2  ;;  %v906_v18 = vrot.slane %v898_v20, 2  ;;  %v907_v21 = vrot.slane %v899_v15, 2  ;;  %v908_v24 = vrot.slane %v900_v0, 2 }
  0xc7   :  { %v919_v6 = vmul.f32 %v1894_v25, %v918_v60  ;;  %v920_v49 = vmul.f32 %v1897_v26, %v918_v60  ;;  %v921_v63 = vmul.f32 %v1900_v48, %v918_v60  ;;  %v922_v4 = vmul.f32 %v1903_v17, %v918_v60 }
  0xc8   :  { %v913_v27 = vadd.f32 %v905_v3, %v891_v5  ;;  %v914_v28 = vadd.f32 %v906_v18, %v892_v7  ;;  %v915_v22 = vadd.f32 %v907_v21, %v893_v8  ;;  %v916_v33 = vadd.f32 %v908_v24, %v894_v10 }
  0xc9   :  { %v927_v36 = vrot.slane %v919_v6, 3  ;;  %v928_v11 = vrot.slane %v920_v49, 3  ;;  %v929_v32 = vrot.slane %v921_v63, 3  ;;  %v930_v37 = vrot.slane %v922_v4, 3 }
  0xca   :  { %v941_v19 = vmul.f32 %v1894_v25, %v940_v61  ;;  %v942_v38 = vmul.f32 %v1897_v26, %v940_v61  ;;  %v943_v39 = vmul.f32 %v1900_v48, %v940_v61  ;;  %v944_v23 = vmul.f32 %v1903_v17, %v940_v61 }
  0xcb   :  { %v935_v42 = vadd.f32 %v927_v36, %v913_v27  ;;  %v936_v12 = vadd.f32 %v928_v11, %v914_v28  ;;  %v937_v43 = vadd.f32 %v929_v32, %v915_v22  ;;  %v938_v30 = vadd.f32 %v930_v37, %v916_v33 }
  0xcc   :  { %v949_v44 = vrot.slane %v941_v19, 4  ;;  %v950_v13 = vrot.slane %v942_v38, 4  ;;  %v951_v31 = vrot.slane %v943_v39, 4  ;;  %v952_v47 = vrot.slane %v944_v23, 4 }
  0xcd   :  { %v860_v50 = vmul.f32 %v1936_v59, %v854_v16  ;;  %v962_v51 = vstv %s1944_s19  ;;  %v982_v52 = vstv %s1946_s20  ;;  %v988_v53 = vstv %s1952_s21 }
  0xce   :  { %v957_v54 = vadd.f32 %v949_v44, %v935_v42  ;;  %v958_v55 = vadd.f32 %v950_v13, %v936_v12  ;;  %v959_v9 = vadd.f32 %v951_v31, %v937_v43  ;;  %v960_v40 = vadd.f32 %v952_v47, %v938_v30 }
  0xcf   :  { %v861_v14 = vmul.f32 %v1936_v59, %v855_v1  ;;  %v1972_v41 = vstv %s1958_s1  ;;  %v983_v57 = vmul.f32 %v1894_v25, %v982_v52  ;;  %v984_v60 = vmul.f32 %v1897_v26, %v982_v52 }
  0xd0   :  { %v963_v61 = vadd.f32 %v962_v51, %v957_v54  ;;  %v964_v5 = vadd.f32 %v962_v51, %v958_v55  ;;  %v1980_v7 = vadd.f32 %v962_v51, %v959_v9  ;;  %v1982_v8 = vadd.f32 %v962_v51, %v960_v40 }
  0xd1   :  { %v989_v10 = vmul.f32 %v1894_v25, %v988_v53  ;;  %v990_v46 = vmul.f32 %v1897_v26, %v988_v53  ;;  %v991_v20 = vmul.f32 %v1900_v48, %v988_v53  ;;  %v992_v15 = vmul.f32 %v1903_v17, %v988_v53 }
  0xd2   :  { %v967_v0 = vmax.f32 %v963_v61, 0.0  ;;  %v968_v16 = vmax.f32 %v964_v5, 0.0  ;;  %v985_v1 = vmul.f32 %v1900_v48, %v982_v52  ;;  %v986_v3 = vmul.f32 %v1903_v17, %v982_v52 }
  0xd3   :  { %v997_v18 = vrot.slane %v989_v10, 1  ;;  %v998_v21 = vrot.slane %v990_v46, 1  ;;  %v999_v24 = vrot.slane %v991_v20, 1  ;;  %v1000_v6 = vrot.slane %v992_v15, 1 }
  0xd4   :  { %v752_v49 = vadd.f32 %v1910_v34, %v1888_v45  ;;  %v862_v63 = vmul.f32 %v1936_v59, %v856_v62  ;;  %v863_v4 = vadd.f32 %v1950_v2, %v1912_v29  ;;  %v864_v27 = vadd.f32 %v860_v50, %v1914_v35 }
  0xd5   :  { %v1999_v28 = vadd.f32 %v861_v14, %v1933_v58  ;;  %v969_v22 = vmax.f32 %v1980_v7, 0.0  ;;  %v970_v33 = vmax.f32 %v1982_v8, 0.0  ;;  %v973_v36 = vmul.f32 %v1972_v41, %v967_v0 }
  0xd6   :  { %v974_v45 = vmul.f32 %v1972_v41, %v968_v16  ;;  %v1005_v34 = vadd.f32 %v997_v18, %v983_v57  ;;  %v1006_v56 = vadd.f32 %v998_v21, %v984_v60  ;;  %v1007_v11 = vadd.f32 %v999_v24, %v985_v1 }
  0xd7   :  { %v1008_v59 = vadd.f32 %v1000_v6, %v986_v3  ;;  %v1010_v62 = vstv %s1968_s3  ;;  %v1032_v32 = vstv %s1976_s22  ;;  %v1054_v29 = vstv %s1978_s23 }
  0xd8   :  { %v1011_v35 = vmul.f32 %v1894_v25, %v1010_v62  ;;  %v1012_v58 = vmul.f32 %v1897_v26, %v1010_v62  ;;  %v1013_v2 = vmul.f32 %v1900_v48, %v1010_v62  ;;  %v1014_v37 = vmul.f32 %v1903_v17, %v1010_v62 }
  0xd9   :  { %v1033_v19 = vmul.f32 %v1894_v25, %v1032_v32  ;;  %v1034_v38 = vmul.f32 %v1897_v26, %v1032_v32  ;;  %v1035_v39 = vmul.f32 %v1900_v48, %v1032_v32  ;;  %v1036_v23 = vmul.f32 %v1903_v17, %v1032_v32 }
  0xda   :  { %v1019_v42 = vrot.slane %v1011_v35, 2  ;;  %v1020_v12 = vrot.slane %v1012_v58, 2  ;;  %v1021_v43 = vrot.slane %v1013_v2, 2  ;;  %v1022_v30 = vrot.slane %v1014_v37, 2 }
  0xdb   :  { %v1041_v44 = vrot.slane %v1033_v19, 3  ;;  %v1042_v13 = vrot.slane %v1034_v38, 3  ;;  %v1043_v31 = vrot.slane %v1035_v39, 3  ;;  %v1044_v47 = vrot.slane %v1036_v23, 3 }
  0xdc   :  { %v1027_v50 = vadd.f32 %v1019_v42, %v1005_v34  ;;  %v1028_v51 = vadd.f32 %v1020_v12, %v1006_v56  ;;  %v1029_v52 = vadd.f32 %v1021_v43, %v1007_v11  ;;  %v1030_v53 = vadd.f32 %v1022_v30, %v1008_v59 }
  0xdd   :  { %v1055_v54 = vmul.f32 %v1894_v25, %v1054_v29  ;;  %v1056_v55 = vmul.f32 %v1897_v26, %v1054_v29  ;;  %v1057_v9 = vmul.f32 %v1900_v48, %v1054_v29  ;;  %v1058_v40 = vmul.f32 %v1903_v17, %v1054_v29 }
  0xde   :  { %v1049_v14 = vadd.f32 %v1041_v44, %v1027_v50  ;;  %v1050_v57 = vadd.f32 %v1042_v13, %v1028_v51  ;;  %v1051_v60 = vadd.f32 %v1043_v31, %v1029_v52  ;;  %v1052_v61 = vadd.f32 %v1044_v47, %v1030_v53 }
  0xdf   :  { %v1063_v5 = vrot.slane %v1055_v54, 4  ;;  %v1064_v7 = vrot.slane %v1056_v55, 4  ;;  %v1065_v8 = vrot.slane %v1057_v9, 4  ;;  %v1066_v10 = vrot.slane %v1058_v40, 4 }
  0xe0   :  { %v866_v46 = vadd.f32 %v862_v63, %v752_v49  ;;  %v975_v20 = vmul.f32 %v1972_v41, %v969_v22  ;;  %v1076_v15 = vstv %s2012_s24  ;;  %v1102_v0 = vstv %s2014_s25 }
  0xe1   :  { %v1071_v16 = vadd.f32 %v1063_v5, %v1049_v14  ;;  %v1072_v1 = vadd.f32 %v1064_v7, %v1050_v57  ;;  %v1073_v3 = vadd.f32 %v1065_v8, %v1051_v60  ;;  %v1074_v18 = vadd.f32 %v1066_v10, %v1052_v61 }
  0xe2   :  { %v976_v21 = vmul.f32 %v1972_v41, %v970_v33  ;;  %v2034_v24 = vadd.f32 %v973_v36, %v863_v4  ;;  %v2036_v6 = vadd.f32 %v974_v45, %v864_v27  ;;  %v1096_v34 = vstv %s2020_s26 }
  0xe3   :  { %v1077_v56 = vadd.f32 %v1076_v15, %v1071_v16  ;;  %v1078_v11 = vadd.f32 %v1076_v15, %v1072_v1  ;;  %v2039_v49 = vadd.f32 %v1076_v15, %v1073_v3  ;;  %v2041_v63 = vadd.f32 %v1076_v15, %v1074_v18 }
  0xe4   :  { %v1103_v22 = vmul.f32 %v1894_v25, %v1102_v0  ;;  %v1104_v41 = vmul.f32 %v1897_v26, %v1102_v0  ;;  %v1105_v4 = vmul.f32 %v1900_v48, %v1102_v0  ;;  %v1106_v27 = vmul.f32 %v1903_v17, %v1102_v0 }
  0xe5   :  { %v1097_v33 = vmul.f32 %v1894_v25, %v1096_v34  ;;  %v1098_v36 = vmul.f32 %v1897_v26, %v1096_v34  ;;  %v1099_v45 = vmul.f32 %v1900_v48, %v1096_v34  ;;  %v1100_v59 = vmul.f32 %v1903_v17, %v1096_v34 }
  0xe6   :  { %v1111_v62 = vrot.slane %v1103_v22, 1  ;;  %v1112_v32 = vrot.slane %v1104_v41, 1  ;;  %v1113_v29 = vrot.slane %v1105_v4, 1  ;;  %v1114_v35 = vrot.slane %v1106_v27, 1 }
  0xe7   :  { %v2056_v58 = vadd.f32 %v975_v20, %v1999_v28  ;;  %v1081_v2 = vmax.f32 %v1077_v56, 0.0  ;;  %v1082_v37 = vmax.f32 %v1078_v11, 0.0  ;;  %v1124_v19 = vstv %s2026_s27 }
  0xe8   :  { %v2059_v38 = vadd.f32 %v976_v21, %v866_v46  ;;  %v1083_v39 = vmax.f32 %v2039_v49, 0.0  ;;  %v1084_v23 = vmax.f32 %v2041_v63, 0.0  ;;  %v1086_v42 = vstv %s2030_s28 }
  0xe9   :  { %v1119_v12 = vadd.f32 %v1111_v62, %v1097_v33  ;;  %v1120_v43 = vadd.f32 %v1112_v32, %v1098_v36  ;;  %v1121_v30 = vadd.f32 %v1113_v29, %v1099_v45  ;;  %v1122_v44 = vadd.f32 %v1114_v35, %v1100_v59 }
  0xea   :  { %v1125_v13 = vmul.f32 %v1894_v25, %v1124_v19  ;;  %v1126_v28 = vmul.f32 %v1897_v26, %v1124_v19  ;;  %v1127_v31 = vmul.f32 %v1900_v48, %v1124_v19  ;;  %v1128_v47 = vmul.f32 %v1903_v17, %v1124_v19 }
  0xeb   :  { %v1087_v50 = vmul.f32 %v1086_v42, %v1081_v2  ;;  %v1088_v51 = vmul.f32 %v1086_v42, %v1082_v37  ;;  %v1146_v52 = vstv %s2043_s29  ;;  %v1168_v53 = vstv %s2045_s30 }
  0xec   :  { %v1133_v54 = vrot.slane %v1125_v13, 2  ;;  %v1134_v55 = vrot.slane %v1126_v28, 2  ;;  %v1135_v9 = vrot.slane %v1127_v31, 2  ;;  %v1136_v40 = vrot.slane %v1128_v47, 2 }
  0xed   :  { %v1147_v14 = vmul.f32 %v1894_v25, %v1146_v52  ;;  %v1148_v57 = vmul.f32 %v1897_v26, %v1146_v52  ;;  %v1149_v60 = vmul.f32 %v1900_v48, %v1146_v52  ;;  %v1150_v61 = vmul.f32 %v1903_v17, %v1146_v52 }
  0xee   :  { %v1141_v5 = vadd.f32 %v1133_v54, %v1119_v12  ;;  %v1142_v7 = vadd.f32 %v1134_v55, %v1120_v43  ;;  %v1143_v8 = vadd.f32 %v1135_v9, %v1121_v30  ;;  %v1144_v10 = vadd.f32 %v1136_v40, %v1122_v44 }
  0xef   :  { %v1155_v46 = vrot.slane %v1147_v14, 3  ;;  %v1156_v20 = vrot.slane %v1148_v57, 3  ;;  %v1157_v15 = vrot.slane %v1149_v60, 3  ;;  %v1158_v0 = vrot.slane %v1150_v61, 3 }
  0xf0   :  { %v1169_v16 = vmul.f32 %v1894_v25, %v1168_v53  ;;  %v1170_v1 = vmul.f32 %v1897_v26, %v1168_v53  ;;  %v1171_v3 = vmul.f32 %v1900_v48, %v1168_v53  ;;  %v1172_v18 = vmul.f32 %v1903_v17, %v1168_v53 }
  0xf1   :  { %v1163_v21 = vadd.f32 %v1155_v46, %v1141_v5  ;;  %v1164_v34 = vadd.f32 %v1156_v20, %v1142_v7  ;;  %v1165_v56 = vadd.f32 %v1157_v15, %v1143_v8  ;;  %v1166_v11 = vadd.f32 %v1158_v0, %v1144_v10 }
  0xf2   :  { %v1177_v49 = vrot.slane %v1169_v16, 4  ;;  %v1178_v63 = vrot.slane %v1170_v1, 4  ;;  %v1179_v22 = vrot.slane %v1171_v3, 4  ;;  %v1180_v41 = vrot.slane %v1172_v18, 4 }
  0xf3   :  { %v1089_v4 = vmul.f32 %v1086_v42, %v1083_v39  ;;  %v1090_v27 = vmul.f32 %v1086_v42, %v1084_v23  ;;  %v1190_v33 = vstv %s2070_s2  ;;  %v1091_v48 = vadd.f32 %v1087_v50, %v2034_v24 }
  0xf4   :  { %v1185_v36 = vadd.f32 %v1177_v49, %v1163_v21  ;;  %v1186_v25 = vadd.f32 %v1178_v63, %v1164_v34  ;;  %v1187_v45 = vadd.f32 %v1179_v22, %v1165_v56  ;;  %v1188_v26 = vadd.f32 %v1180_v41, %v1166_v11 }
  0xf5   :  { %v1436_v59 = vmov 1966171168   ;;  %v1224_v62 = vlaneseq  ;;  %v1092_v37 = vadd.f32 %v1088_v51, %v2036_v6  ;;  %v1093_v19 = vadd.f32 %v1089_v4, %v2056_v58 }
  0xf6   :  { %v1222_v17 = vunpack.c.l.s4 %v1436_v59  ;;  %v1191_v32 = vadd.f32 %v1190_v33, %v1185_v36  ;;  %v1192_v29 = vadd.f32 %v1190_v33, %v1186_v25  ;;  %v1193_v35 = vadd.f32 %v1190_v33, %v1187_v45 }
  0xf7   :  { %v1194_v2 = vadd.f32 %v1190_v33, %v1188_v26  ;;  %v1094_v39 = vadd.f32 %v1090_v27, %v2059_v38  ;;  %v1200_v23 = vstv %s2076_s6  ;;  %v1225_v24 = vshrl.u32 %v1224_v62, 7 }
  0xf8   :  { %v1195_v42 = vmax.f32 %v1191_v32, 0.0  ;;  %v1196_v12 = vmax.f32 %v1192_v29, 0.0  ;;  %v1197_v43 = vmax.f32 %v1193_v35, 0.0  ;;  %v1223_v44 = vunpack.c.0.s8 %v1222_v17 }
  0xf9   :  { %v1198_v30 = vmax.f32 %v1194_v2, 0.0  ;;  %v1210_v50 = vstv %s2107_s4  ;;  %vm1246_vm0 = vcmp.lt.s32.totalorder %v1224_v62, 512  ;;  %s1400_s4 = scalar_lea.vmem %s1256_s10, 64 }
  0xfa   :  { %v1201_v13 = vmul.f32 %v1200_v23, %v1195_v42  ;;  %v1202_v28 = vmul.f32 %v1200_v23, %v1196_v12  ;;  %v1203_v31 = vmul.f32 %v1200_v23, %v1197_v43  ;;  %v1226_v38 = vsub.s32 %v1223_v44, %v1225_v24  ;;  %p1401_p7 = scmp.ne.s32.totalorder %s1256_s10, %s1400_s4  ;;  %p1406_p9 = scmp.lt.s32.totalorder %s1400_s4, %s1400_s4 }
  0xfb   :  { %v1204_v47 = vmul.f32 %v1200_v23, %v1198_v30 }
  0xfc   :  { %v1205_v6 = vadd.f32 %v1201_v13, %v1091_v48  ;;  %v1206_v51 = vadd.f32 %v1202_v28, %v1092_v37  ;;  %v1207_v58 = vadd.f32 %v1203_v31, %v1093_v19  ;;  %p1407_p10 = por %p1406_p9, %p1405_p8 }
  0xfd   :  { %v1208_v52 = vadd.f32 %v1204_v47, %v1094_v39 }
  0xfe   :  { %v1211_v53 = vadd.f32 %v1210_v50, %v1205_v6  ;;  %v1212_v54 = vadd.f32 %v1210_v50, %v1206_v51  ;;  %v1213_v55 = vadd.f32 %v1210_v50, %v1207_v58  ;;  %p1408_p11 = pnand %p1407_p10, %p1401_p7 }
  0xff   :  { %v1214_v9 = vadd.f32 %v1210_v50, %v1208_v52 }
 0x100   :  { %v1219_v40 = vcombine.low %v1211_v53, %v1212_v54 }
 0x101   :  { %v1220_v14 = vcombine.low %v1213_v55, %v1214_v9 }
 0x102   :  { %v1227_v57 = vrot.slane %v1219_v40, %v1226_v38 }
 0x103   :  { %v1234_v60 = vrot.slane %v1220_v14, %v1226_v38 }
 0x105   :  { %v1235_v61 = vcombine.low %v1227_v57, %v1234_v60 }
 0x107   :  { %v1242_v5 = vrot.slane %v1235_v61, %v1226_v38 }
 0x109   :  { %1248 = vst.msk [vmem:[#allocation12] sm:$0xf] %vm1246_vm0, %v1242_v5 }
 0x10a   :  { %1411 = shalt.err (!%p1408_p11)
}
 0x10b   :  { %s1412_s13 = scalar_lea.hbm %s2108_s5, 64 }
 0x10c   :  { %p1413_p12 = scmp.ne.s32.totalorder %s2108_s5, %s1412_s13  ;;  %p1416_p13 = scmp.lt.u32.totalorder %s1412_s13, %s2108_s5 }
 0x10e   :  { %p1418_p0 = pnand %p1416_p13, %p1413_p12 }
 0x110   :  { %1421 = shalt.err (!%p1418_p0)
}
 0x111   :  { %1258 = dma.vmem_to_hbm [thread:$0]  %s1256_s10, 64, %s2108_s5, [#allocation5]  }
 0x112   :  { %1430 = dma.done.wait [#allocation5], 64  }
 0x113   :  { %1431 = vsyncadd [#allocation5], 4294967232 }
 0x114   :  { %1262 = vsyncpa [#allocation4], 1 }
 0x115   :  { %1263 = vsyncpa [#allocation5], 1 }
 0x116   :  { %1264 = vsyncpa [#allocation6], 1 }
 0x117   :  { %1265 = vsyncpa [#allocation7], 1 }
 0x118   :  { %1266 = vsyncpa [#allocation11], 1 }

</bundles_post_ra>
